<compile_context>
chip_gen: v7x
topology: tpu7x:2x2x1
jax: 0.10.0
libtpu: 0.0.40
codegen_flags: <defaults>
</compile_context>

<pallas_src>
import functools

import numpy as np
import jax
import jax.numpy as jnp
from jax import lax
from jax.experimental import pallas as pl
from jax.experimental.pallas import tpu as pltpu

HID = 32  # encoder hidden channels


# ----------------------------------------------------------------------------
# Fused kernel: [conv3x3+bias+relu+maxpool2x2] x 2  ->  global average pool
# ----------------------------------------------------------------------------
def _protonet_kernel(x_ref, w1_ref, b1_ref, w2_ref, b2_ref, o_ref, pad2,
                     *, NB, H, W, Cin, C):
    # x_ref : (H+2, NB, W*Cin)  bf16   H-halo'd input slab (lane dim = W*Cin)
    # w1_ref: (3, W*Cin, W*C)   bf16   banded conv-1 weights (one per H tap)
    # b1_ref: (1, W*C)          f32    bias tiled across W
    # w2_ref: (3, W1*C, W1*C)   bf16   banded conv-2 weights
    # b2_ref: (1, W1*C)         f32
    # o_ref : (NB, C)           f32    per-sample embeddings
    # pad2  : (H1+2, NB, W1*C)  bf16   VMEM scratch: H-halo'd pooled conv-1 out
    H1, W1 = H // 2, W // 2
    H2, W2 = H1 // 2, W1 // 2
    L1, L2 = W * C, W1 * C

    def conv_block(lhs_tap, w_ref, b_ref, h, k_lanes, n_lanes):
        # 3x3 'same' conv as 3 accumulating banded matmuls (one per H tap);
        # W taps / W zero-padding live inside the banded weight matrices.
        acc = None
        for ki in range(3):
            lhs = lhs_tap(ki).reshape(h * NB, k_lanes)
            t = jnp.dot(lhs, w_ref[ki], preferred_element_type=jnp.float32)
            acc = t if acc is None else acc + t
        a = jnp.maximum(acc + b_ref[...], 0.0)               # bias + ReLU (f32)
        # 2x2 maxpool.  H: leading-dim fold.  W: output columns were emitted as
        # [even | odd], so pooling is a max of the two (vreg-aligned) lane
        # halves -- pooled columns come out compact and in natural order.
        a = a.reshape(h // 2, 2, NB, n_lanes).max(axis=1)    # (h/2, NB, n_lanes)
        return jnp.maximum(a[:, :, :n_lanes // 2], a[:, :, n_lanes // 2:])

    # ---- stage 1: conv1 + ReLU + pool (input H halo already in x_ref) ------
    a1 = conv_block(lambda ki: x_ref[ki:ki + H], w1_ref, b1_ref,
                    H, W * Cin, L1)                          # (H1, NB, L2) f32

    # ---- stage 2 lhs staging: zero only the 2 halo rows, interior in bf16 --
    pad2[0] = jnp.zeros((NB, L2), jnp.bfloat16)
    pad2[H1 + 1] = jnp.zeros((NB, L2), jnp.bfloat16)
    pad2[1:H1 + 1] = a1.astype(jnp.bfloat16)

    # ---- stage 2: conv2 + ReLU + pool ---------------------------------------
    a2 = conv_block(lambda ki: pad2[ki:ki + H1], w2_ref, b2_ref,
                    H1, L2, L2)                              # (H2, NB, W2*C) f32

    # ---- AdaptiveAvgPool2d((1,1)): mean over the H2 x W2 spatial grid -------
    s = jnp.sum(a2, axis=0)                                  # (NB, W2*C)
    emb = s[:, :C]
    for k in range(1, W2):
        emb = emb + s[:, k * C:(k + 1) * C]
    # Output is a one-off few-KB (NB, C) tile; making it lane-dense would need
    # a sublane->lane transpose that costs more than the tiny masked store.
    o_ref[...] = emb * (1.0 / (H2 * W2))


# ----------------------------------------------------------------------------
# Wrapper-side weight / layout prep (layout plumbing, not compute hoisting)
# ----------------------------------------------------------------------------
def _banded_conv_weights(w_oihw, width, dtype=jnp.bfloat16):
    """3x3 'same' conv along W (at a fixed H tap) as a banded matrix.

    Returns B of shape (3, width*cin, width*cout) such that for a slab
    lhs (rows, width*cin) with lane order (W-major, channel-minor),
    lhs @ B[ki] is the H-tap-ki contribution of the conv, with the W 'same'
    zero padding baked in.  Output columns are permuted to [even | odd] so the
    following 2x2 maxpool's W direction is a max of the two lane halves.
    """
    cout, cin, kh, kw = w_oihw.shape
    w_hwio = jnp.transpose(w_oihw, (2, 3, 1, 0)).astype(jnp.float32)  # (kh,kw,ci,co)
    out_perm = list(range(0, width, 2)) + list(range(1, width, 2))
    P = np.zeros((kw, width, width), np.float32)   # (kj, in_col, out_block)
    for kj in range(kw):
        for j, wo in enumerate(out_perm):
            wi = wo + kj - 1
            if 0 <= wi < width:
                P[kj, wi, j] = 1.0
    B = jnp.einsum('kbw,hkio->hbiwo', jnp.asarray(P), w_hwio)
    return B.reshape(kh, width * cin, width * cout).astype(dtype)


def _vmem_block_bytes(nb, H, W, Cin, C):
    # Rough per-grid-step VMEM working set (blocks, scratch, big live values).
    H1, W1 = H // 2, W // 2
    L1, L2 = W * C, W1 * C
    b = 2 * (H + 2) * nb * (W * Cin) * 2        # input block (bf16, double-buffered)
    b += 2 * nb * C * 4                         # output block (f32, double-buffered)
    b += (H1 + 2) * nb * L2 * 2                 # pad2 scratch (bf16)
    b += H * nb * L1 * 4                        # conv-1 f32 accumulator
    b += H1 * nb * L1 * 4                       # pooled conv-1 activation (f32)
    b += H1 * nb * L2 * 4                       # conv-2 f32 accumulator
    b += H1 * nb * L2 * 2                       # one conv-2 lhs tap (bf16)
    return b


def _weight_bytes(W, Cin, C):
    W1 = W // 2
    return 2 * (3 * W * Cin * W * C + 3 * W1 * C * W1 * C) * 2 + 2 * (W * C + W1 * C) * 4


def _pick_batch_block(n, H, W, Cin, C, vmem_budget):
    # Prefer a single grid step (the grid is a serial loop on one TensorCore);
    # shrink the per-step batch only when the working set would not fit VMEM.
    # Sub-blocks must be multiples of 8 (sublane rule) unless they equal N.
    # TODO(synk): on v7x (2 TCs) prefer >=2 balanced grid steps when N is large.
    cands = [n] + [d for d in range(n - 1, 0, -1) if n % d == 0 and d % 8 == 0]
    for d in cands:
        if _vmem_block_bytes(d, H, W, Cin, C) <= vmem_budget:
            return d
    return cands[-1]


def protonet_forward(inputs, params):
    # inputs: (n_way, n_shot, Cin, H, W)  -- PyTorch NCHW per sample
    n_way, n_shot, Cin, H, W = inputs.shape
    assert H % 4 == 0 and W % 4 == 0, "two 2x2 maxpools need H, W divisible by 4"
    N = n_way * n_shot
    H1, W1 = H // 2, W // 2

    # Lane-dense input slab (H+2, N, W*Cin) with the conv-1 H halo (2 zero rows).
    x = jnp.transpose(inputs.reshape(N, Cin, H, W), (2, 0, 3, 1))   # (H, N, W, Cin)
    x = x.reshape(H, N, W * Cin)
    xp = jnp.pad(x, ((1, 1), (0, 0), (0, 0))).astype(jnp.bfloat16)

    (w1, b1), (w2, b2) = params
    w1b = _banded_conv_weights(w1, W)       # (3, W*Cin, W*HID)
    w2b = _banded_conv_weights(w2, W1)      # (3, W1*HID, W1*HID)
    b1t = jnp.tile(b1, W).reshape(1, W * HID).astype(jnp.float32)
    b2t = jnp.tile(b2, W1).reshape(1, W1 * HID).astype(jnp.float32)

    try:
        vmem_cap = int(pltpu.get_tpu_info().vmem_capacity_bytes)
    except Exception:
        vmem_cap = 64 * 1024 * 1024         # conservative (v7x per-core size)
    budget = int(0.4 * vmem_cap) - _weight_bytes(W, Cin, HID)
    NB = _pick_batch_block(N, H, W, Cin, HID, budget)
    nblk = N // NB
    vmem_limit = int(min(0.9 * vmem_cap,
                         max(32 * 1024 * 1024,
                             2 * (_vmem_block_bytes(NB, H, W, Cin, HID)
                                  + _weight_bytes(W, Cin, HID)))))

    kernel = functools.partial(_protonet_kernel, NB=NB, H=H, W=W, Cin=Cin, C=HID)
    out = pl.pallas_call(
        kernel,
        out_shape=jax.ShapeDtypeStruct((N, HID), jnp.float32),
        grid_spec=pltpu.PrefetchScalarGridSpec(
            num_scalar_prefetch=0,
            grid=(nblk,),
            in_specs=[
                pl.BlockSpec((H + 2, NB, W * Cin), lambda n: (0, n, 0)),
                pl.BlockSpec((3, W * Cin, W * HID), lambda n: (0, 0, 0)),
                pl.BlockSpec((1, W * HID), lambda n: (0, 0)),
                pl.BlockSpec((3, W1 * HID, W1 * HID), lambda n: (0, 0, 0)),
                pl.BlockSpec((1, W1 * HID), lambda n: (0, 0)),
            ],
            out_specs=pl.BlockSpec((NB, HID), lambda n: (n, 0)),
            scratch_shapes=[
                pltpu.VMEM((H1 + 2, NB, W1 * HID), jnp.bfloat16),  # conv-2 lhs (halo'd)
            ],
        ),
        compiler_params=pltpu.CompilerParams(
            dimension_semantics=("parallel",),
            vmem_limit_bytes=vmem_limit),
    )(xp, w1b, b1t, w2b, b2t)
    return out.reshape(n_way, n_shot, HID)


# ----------------------------------------------------------------------------
# Parameters (deterministic, PyTorch-shaped)
# ----------------------------------------------------------------------------
def init_params(key, cin):
    k1, k2, k3, k4 = jax.random.split(key, 4)
    # PyTorch conv weight layout: (Cout, Cin, kH, kW)
    w1 = 0.1 * jax.random.normal(k1, (HID, cin, 3, 3), jnp.float32)
    b1 = 0.05 * jax.random.normal(k2, (HID,), jnp.float32)
    w2 = 0.1 * jax.random.normal(k3, (HID, HID, 3, 3), jnp.float32)
    b2 = 0.05 * jax.random.normal(k4, (HID,), jnp.float32)
    return (w1, b1), (w2, b2)


# ----------------------------------------------------------------------------
# Pure-JAX (f32) reference for correctness
# ----------------------------------------------------------------------------
def reference_forward(inputs, params):
    n_way, n_shot, C, H, W = inputs.shape
    x = jnp.transpose(inputs.reshape(-1, C, H, W), (0, 2, 3, 1))
    for (w, b) in params:
        w_hwio = jnp.transpose(w, (2, 3, 1, 0))
        x = lax.conv_general_dilated(
            x, w_hwio, (1, 1), 'SAME',
            dimension_numbers=('NHWC', 'HWIO', 'NHWC'))
        x = jnp.maximum(x + b, 0.0)
        n, h, wd, c = x.shape
        x = x.reshape(n, h // 2, 2, wd // 2, 2, c).max(axis=(2, 4))
    emb = jnp.mean(x, axis=(1, 2))                    # AdaptiveAvgPool2d((1,1))
    return emb.reshape(n_way, n_shot, -1)


if __name__ == "__main__":
    key = jax.random.PRNGKey(0)
    k_in, k_par = jax.random.split(key)

    n_way, n_shot, C, H, W = 2, 4, 3, 16, 16
    inputs = jax.random.normal(k_in, (n_way, n_shot, C, H, W), jnp.float32)
    params = init_params(k_par, C)

    out = jax.block_until_ready(protonet_forward(inputs, params))
    ref = reference_forward(inputs, params)

    assert out.shape == (n_way, n_shot, HID), out.shape
    # kernel uses bf16 MXU inputs / bf16 intermediates with f32 accumulation
    max_err = float(jnp.max(jnp.abs(out - ref)))
    assert max_err < 5e-2, f"mismatch vs f32 reference: {max_err}"

    print("KERNEL_OK")
</pallas_src>

<mosaic_0001>
module attributes {stable_mosaic.version = 11 : i64} {
  func.func @_protonet_kernel(%arg0: i32, %arg1: memref<18x8x48xbf16, #tpu.memory_space<vmem>>, %arg2: memref<3x48x512xbf16, #tpu.memory_space<vmem>>, %arg3: memref<1x512xf32, #tpu.memory_space<vmem>>, %arg4: memref<3x256x256xbf16, #tpu.memory_space<vmem>>, %arg5: memref<1x256xf32, #tpu.memory_space<vmem>>, %arg6: memref<8x32xf32, #tpu.memory_space<vmem>>, %arg7: memref<10x8x256xbf16, #tpu.memory_space<vmem>>) attributes {dimension_semantics = [#tpu.dimension_semantics<parallel>], iteration_bounds = array<i64: 1>, scalar_prefetch = 0 : i64, scratch_operands = 1 : i64, tpu.core_type = #tpu.core_type<tc>, window_params = [{transform_indices = @transform_0, window_bounds = array<i64: 18, 8, 48>}, {pipeline_mode = #tpu.pipeline_mode<synchronous>, transform_indices = @transform_1, window_bounds = array<i64: 3, 48, 512>}, {pipeline_mode = #tpu.pipeline_mode<synchronous>, transform_indices = @transform_2, window_bounds = array<i64: 1, 512>}, {pipeline_mode = #tpu.pipeline_mode<synchronous>, transform_indices = @transform_3, window_bounds = array<i64: 3, 256, 256>}, {pipeline_mode = #tpu.pipeline_mode<synchronous>, transform_indices = @transform_4, window_bounds = array<i64: 1, 256>}, {transform_indices = @transform_5, window_bounds = array<i64: 8, 32>}]} {
    %c0 = arith.constant 0 : index
    %c0_0 = arith.constant 0 : index
    %c0_1 = arith.constant 0 : index
    %0 = vector.load %arg1[%c0, %c0_0, %c0_1] : memref<18x8x48xbf16, #tpu.memory_space<vmem>>, vector<16x8x48xbf16>
    %1 = vector.shape_cast %0 : vector<16x8x48xbf16> to vector<128x48xbf16>
    %c0_2 = arith.constant 0 : index
    %c0_3 = arith.constant 0 : index
    %c0_4 = arith.constant 0 : index
    %2 = vector.load %arg2[%c0_2, %c0_3, %c0_4] : memref<3x48x512xbf16, #tpu.memory_space<vmem>>, vector<1x48x512xbf16>
    %3 = vector.shape_cast %2 : vector<1x48x512xbf16> to vector<48x512xbf16>
    %cst = arith.constant dense<0.000000e+00> : vector<128x512xf32>
    %4 = tpu.matmul %1, %3, %cst {dimension_numbers = #tpu.dot_dimension_numbers<[1], [0], [0], [1], [0, 0, 1, 1], [], []>} : vector<128x48xbf16>, vector<48x512xbf16>, vector<128x512xf32> -> vector<128x512xf32>
    %c1 = arith.constant 1 : index
    %c0_5 = arith.constant 0 : index
    %c0_6 = arith.constant 0 : index
    %5 = vector.load %arg1[%c1, %c0_5, %c0_6] : memref<18x8x48xbf16, #tpu.memory_space<vmem>>, vector<16x8x48xbf16>
    %6 = vector.shape_cast %5 : vector<16x8x48xbf16> to vector<128x48xbf16>
    %c1_7 = arith.constant 1 : index
    %c0_8 = arith.constant 0 : index
    %c0_9 = arith.constant 0 : index
    %7 = vector.load %arg2[%c1_7, %c0_8, %c0_9] : memref<3x48x512xbf16, #tpu.memory_space<vmem>>, vector<1x48x512xbf16>
    %8 = vector.shape_cast %7 : vector<1x48x512xbf16> to vector<48x512xbf16>
    %cst_10 = arith.constant dense<0.000000e+00> : vector<128x512xf32>
    %9 = tpu.matmul %6, %8, %cst_10 {dimension_numbers = #tpu.dot_dimension_numbers<[1], [0], [0], [1], [0, 0, 1, 1], [], []>} : vector<128x48xbf16>, vector<48x512xbf16>, vector<128x512xf32> -> vector<128x512xf32>
    %10 = arith.addf %4, %9 : vector<128x512xf32>
    %c2 = arith.constant 2 : index
    %c0_11 = arith.constant 0 : index
    %c0_12 = arith.constant 0 : index
    %11 = vector.load %arg1[%c2, %c0_11, %c0_12] : memref<18x8x48xbf16, #tpu.memory_space<vmem>>, vector<16x8x48xbf16>
    %12 = vector.shape_cast %11 : vector<16x8x48xbf16> to vector<128x48xbf16>
    %c2_13 = arith.constant 2 : index
    %c0_14 = arith.constant 0 : index
    %c0_15 = arith.constant 0 : index
    %13 = vector.load %arg2[%c2_13, %c0_14, %c0_15] : memref<3x48x512xbf16, #tpu.memory_space<vmem>>, vector<1x48x512xbf16>
    %14 = vector.shape_cast %13 : vector<1x48x512xbf16> to vector<48x512xbf16>
    %cst_16 = arith.constant dense<0.000000e+00> : vector<128x512xf32>
    %15 = tpu.matmul %12, %14, %cst_16 {dimension_numbers = #tpu.dot_dimension_numbers<[1], [0], [0], [1], [0, 0, 1, 1], [], []>} : vector<128x48xbf16>, vector<48x512xbf16>, vector<128x512xf32> -> vector<128x512xf32>
    %16 = arith.addf %10, %15 : vector<128x512xf32>
    %c0_17 = arith.constant 0 : index
    %c0_18 = arith.constant 0 : index
    %17 = vector.load %arg3[%c0_17, %c0_18] : memref<1x512xf32, #tpu.memory_space<vmem>>, vector<1x512xf32>
    %18 = vector.broadcast %17 : vector<1x512xf32> to vector<128x512xf32>
    %19 = arith.addf %16, %18 : vector<128x512xf32>
    %cst_19 = arith.constant 0.000000e+00 : f32
    %20 = vector.broadcast %cst_19 : f32 to vector<128x512xf32>
    %21 = arith.maximumf %19, %20 : vector<128x512xf32>
    %22 = vector.shape_cast %21 : vector<128x512xf32> to vector<8x2x8x512xf32>
    %cst_20 = arith.constant dense<0xFF800000> : vector<8x8x512xf32>
    %23 = vector.multi_reduction <maximumf>, %22, %cst_20 [1] : vector<8x2x8x512xf32> to vector<8x8x512xf32>
    %24 = vector.extract_strided_slice %23 {offsets = [0, 0, 0], sizes = [8, 8, 256], strides = [1, 1, 1]} : vector<8x8x512xf32> to vector<8x8x256xf32>
    %25 = vector.extract_strided_slice %23 {offsets = [0, 0, 256], sizes = [8, 8, 256], strides = [1, 1, 1]} : vector<8x8x512xf32> to vector<8x8x256xf32>
    %26 = arith.maximumf %24, %25 : vector<8x8x256xf32>
    %cst_21 = arith.constant 0.000000e+00 : bf16
    %27 = vector.broadcast %cst_21 : bf16 to vector<8x256xbf16>
    %c0_22 = arith.constant 0 : index
    %c0_23 = arith.constant 0 : index
    %c0_24 = arith.constant 0 : index
    %28 = vector.load %arg7[%c0_22, %c0_23, %c0_24] : memref<10x8x256xbf16, #tpu.memory_space<vmem>>, vector<1x8x256xbf16>
    %29 = vector.shape_cast %28 : vector<1x8x256xbf16> to vector<8x256xbf16>
    %30 = vector.shape_cast %27 : vector<8x256xbf16> to vector<1x8x256xbf16>
    tpu.vector_store %arg7[%c0_22, %c0_23, %c0_24], %30 {strides = array<i32>} : memref<10x8x256xbf16, #tpu.memory_space<vmem>>, vector<1x8x256xbf16>,
    %cst_25 = arith.constant 0.000000e+00 : bf16
    %31 = vector.broadcast %cst_25 : bf16 to vector<8x256xbf16>
    %c9 = arith.constant 9 : index
    %c0_26 = arith.constant 0 : index
    %c0_27 = arith.constant 0 : index
    %32 = vector.load %arg7[%c9, %c0_26, %c0_27] : memref<10x8x256xbf16, #tpu.memory_space<vmem>>, vector<1x8x256xbf16>
    %33 = vector.shape_cast %32 : vector<1x8x256xbf16> to vector<8x256xbf16>
    %34 = vector.shape_cast %31 : vector<8x256xbf16> to vector<1x8x256xbf16>
    tpu.vector_store %arg7[%c9, %c0_26, %c0_27], %34 {strides = array<i32>} : memref<10x8x256xbf16, #tpu.memory_space<vmem>>, vector<1x8x256xbf16>,
    %35 = arith.truncf %26 : vector<8x8x256xf32> to vector<8x8x256xbf16>
    %c1_28 = arith.constant 1 : index
    %c0_29 = arith.constant 0 : index
    %c0_30 = arith.constant 0 : index
    %36 = vector.load %arg7[%c1_28, %c0_29, %c0_30] : memref<10x8x256xbf16, #tpu.memory_space<vmem>>, vector<8x8x256xbf16>
    tpu.vector_store %arg7[%c1_28, %c0_29, %c0_30], %35 {strides = array<i32>} : memref<10x8x256xbf16, #tpu.memory_space<vmem>>, vector<8x8x256xbf16>,
    %c0_31 = arith.constant 0 : index
    %c0_32 = arith.constant 0 : index
    %c0_33 = arith.constant 0 : index
    %37 = vector.load %arg7[%c0_31, %c0_32, %c0_33] : memref<10x8x256xbf16, #tpu.memory_space<vmem>>, vector<8x8x256xbf16>
    %38 = vector.shape_cast %37 : vector<8x8x256xbf16> to vector<64x256xbf16>
    %c0_34 = arith.constant 0 : index
    %c0_35 = arith.constant 0 : index
    %c0_36 = arith.constant 0 : index
    %39 = vector.load %arg4[%c0_34, %c0_35, %c0_36] : memref<3x256x256xbf16, #tpu.memory_space<vmem>>, vector<1x256x256xbf16>
    %40 = vector.shape_cast %39 : vector<1x256x256xbf16> to vector<256x256xbf16>
    %cst_37 = arith.constant dense<0.000000e+00> : vector<64x256xf32>
    %41 = tpu.matmul %38, %40, %cst_37 {dimension_numbers = #tpu.dot_dimension_numbers<[1], [0], [0], [1], [0, 0, 1, 1], [], []>} : vector<64x256xbf16>, vector<256x256xbf16>, vector<64x256xf32> -> vector<64x256xf32>
    %c1_38 = arith.constant 1 : index
    %c0_39 = arith.constant 0 : index
    %c0_40 = arith.constant 0 : index
    %42 = vector.load %arg7[%c1_38, %c0_39, %c0_40] : memref<10x8x256xbf16, #tpu.memory_space<vmem>>, vector<8x8x256xbf16>
    %43 = vector.shape_cast %42 : vector<8x8x256xbf16> to vector<64x256xbf16>
    %c1_41 = arith.constant 1 : index
    %c0_42 = arith.constant 0 : index
    %c0_43 = arith.constant 0 : index
    %44 = vector.load %arg4[%c1_41, %c0_42, %c0_43] : memref<3x256x256xbf16, #tpu.memory_space<vmem>>, vector<1x256x256xbf16>
    %45 = vector.shape_cast %44 : vector<1x256x256xbf16> to vector<256x256xbf16>
    %cst_44 = arith.constant dense<0.000000e+00> : vector<64x256xf32>
    %46 = tpu.matmul %43, %45, %cst_44 {dimension_numbers = #tpu.dot_dimension_numbers<[1], [0], [0], [1], [0, 0, 1, 1], [], []>} : vector<64x256xbf16>, vector<256x256xbf16>, vector<64x256xf32> -> vector<64x256xf32>
    %47 = arith.addf %41, %46 : vector<64x256xf32>
    %c2_45 = arith.constant 2 : index
    %c0_46 = arith.constant 0 : index
    %c0_47 = arith.constant 0 : index
    %48 = vector.load %arg7[%c2_45, %c0_46, %c0_47] : memref<10x8x256xbf16, #tpu.memory_space<vmem>>, vector<8x8x256xbf16>
    %49 = vector.shape_cast %48 : vector<8x8x256xbf16> to vector<64x256xbf16>
    %c2_48 = arith.constant 2 : index
    %c0_49 = arith.constant 0 : index
    %c0_50 = arith.constant 0 : index
    %50 = vector.load %arg4[%c2_48, %c0_49, %c0_50] : memref<3x256x256xbf16, #tpu.memory_space<vmem>>, vector<1x256x256xbf16>
    %51 = vector.shape_cast %50 : vector<1x256x256xbf16> to vector<256x256xbf16>
    %cst_51 = arith.constant dense<0.000000e+00> : vector<64x256xf32>
    %52 = tpu.matmul %49, %51, %cst_51 {dimension_numbers = #tpu.dot_dimension_numbers<[1], [0], [0], [1], [0, 0, 1, 1], [], []>} : vector<64x256xbf16>, vector<256x256xbf16>, vector<64x256xf32> -> vector<64x256xf32>
    %53 = arith.addf %47, %52 : vector<64x256xf32>
    %c0_52 = arith.constant 0 : index
    %c0_53 = arith.constant 0 : index
    %54 = vector.load %arg5[%c0_52, %c0_53] : memref<1x256xf32, #tpu.memory_space<vmem>>, vector<1x256xf32>
    %55 = vector.broadcast %54 : vector<1x256xf32> to vector<64x256xf32>
    %56 = arith.addf %53, %55 : vector<64x256xf32>
    %cst_54 = arith.constant 0.000000e+00 : f32
    %57 = vector.broadcast %cst_54 : f32 to vector<64x256xf32>
    %58 = arith.maximumf %56, %57 : vector<64x256xf32>
    %59 = vector.shape_cast %58 : vector<64x256xf32> to vector<4x2x8x256xf32>
    %cst_55 = arith.constant dense<0xFF800000> : vector<4x8x256xf32>
    %60 = vector.multi_reduction <maximumf>, %59, %cst_55 [1] : vector<4x2x8x256xf32> to vector<4x8x256xf32>
    %61 = vector.extract_strided_slice %60 {offsets = [0, 0, 0], sizes = [4, 8, 128], strides = [1, 1, 1]} : vector<4x8x256xf32> to vector<4x8x128xf32>
    %62 = vector.extract_strided_slice %60 {offsets = [0, 0, 128], sizes = [4, 8, 128], strides = [1, 1, 1]} : vector<4x8x256xf32> to vector<4x8x128xf32>
    %63 = arith.maximumf %61, %62 : vector<4x8x128xf32>
    %cst_56 = arith.constant dense<0.000000e+00> : vector<8x128xf32>
    %64 = vector.multi_reduction <add>, %63, %cst_56 [0] : vector<4x8x128xf32> to vector<8x128xf32>
    %65 = vector.extract_strided_slice %64 {offsets = [0, 0], sizes = [8, 32], strides = [1, 1]} : vector<8x128xf32> to vector<8x32xf32>
    %66 = vector.extract_strided_slice %64 {offsets = [0, 32], sizes = [8, 32], strides = [1, 1]} : vector<8x128xf32> to vector<8x32xf32>
    %67 = arith.addf %65, %66 : vector<8x32xf32>
    %68 = vector.extract_strided_slice %64 {offsets = [0, 64], sizes = [8, 32], strides = [1, 1]} : vector<8x128xf32> to vector<8x32xf32>
    %69 = arith.addf %67, %68 : vector<8x32xf32>
    %70 = vector.extract_strided_slice %64 {offsets = [0, 96], sizes = [8, 32], strides = [1, 1]} : vector<8x128xf32> to vector<8x32xf32>
    %71 = arith.addf %69, %70 : vector<8x32xf32>
    %cst_57 = arith.constant 6.250000e-02 : f32
    %72 = vector.broadcast %cst_57 : f32 to vector<8x32xf32>
    %73 = arith.mulf %71, %72 : vector<8x32xf32>
    %c0_58 = arith.constant 0 : index
    %c0_59 = arith.constant 0 : index
    %74 = vector.load %arg6[%c0_58, %c0_59] : memref<8x32xf32, #tpu.memory_space<vmem>>, vector<8x32xf32>
    tpu.vector_store %arg6[%c0_58, %c0_59], %73 {strides = array<i32>} : memref<8x32xf32, #tpu.memory_space<vmem>>, vector<8x32xf32>,
    return
  }
  func.func @transform_0(%arg0: i32) -> (i32, i32, i32) {
    %c0_i32 = arith.constant 0 : i32
    %c0_i32_0 = arith.constant 0 : i32
    %c0_i32_1 = arith.constant 0 : i32
    return %c0_i32, %arg0, %c0_i32_0 : i32, i32, i32
  }
  func.func @transform_1(%arg0: i32) -> (i32, i32, i32) {
    %c0_i32 = arith.constant 0 : i32
    %c0_i32_0 = arith.constant 0 : i32
    %c0_i32_1 = arith.constant 0 : i32
    %c0_i32_2 = arith.constant 0 : i32
    return %c0_i32, %c0_i32_0, %c0_i32_1 : i32, i32, i32
  }
  func.func @transform_2(%arg0: i32) -> (i32, i32) {
    %c0_i32 = arith.constant 0 : i32
    %c0_i32_0 = arith.constant 0 : i32
    %c0_i32_1 = arith.constant 0 : i32
    return %c0_i32, %c0_i32_0 : i32, i32
  }
  func.func @transform_3(%arg0: i32) -> (i32, i32, i32) {
    %c0_i32 = arith.constant 0 : i32
    %c0_i32_0 = arith.constant 0 : i32
    %c0_i32_1 = arith.constant 0 : i32
    %c0_i32_2 = arith.constant 0 : i32
    return %c0_i32, %c0_i32_0, %c0_i32_1 : i32, i32, i32
  }
  func.func @transform_4(%arg0: i32) -> (i32, i32) {
    %c0_i32 = arith.constant 0 : i32
    %c0_i32_0 = arith.constant 0 : i32
    %c0_i32_1 = arith.constant 0 : i32
    return %c0_i32, %c0_i32_0 : i32, i32
  }
  func.func @transform_5(%arg0: i32) -> (i32, i32) {
    %c0_i32 = arith.constant 0 : i32
    %c0_i32_0 = arith.constant 0 : i32
    return %arg0, %c0_i32 : i32, i32
  }
}

</mosaic_0001>

<bundles_post_ra>
// kernel: tpu_custom_call.1
= control target key start
LH: loop header
LB: loop body
LE: loop exit
PB: predicated region body
PF: predicated region fallthrough
CT: control target
= control target key end

     0   :  { %10 = vsyncpa [#allocation4], 0  ;;  %s3874_s0 = inlined_call_operand.hbm [shape: bf16[18,8,48], index: 0, kind: input, shape index: {}]   ;;  %s3875_s1 = inlined_call_operand.hbm [shape: bf16[3,48,512], index: 1, kind: input, shape index: {}]   ;;  %s3876_s2 = inlined_call_operand.vmem [shape: f32[1,512], index: 2, kind: input, shape index: {}]   ;;  %s3877_s3 = inlined_call_operand.hbm [shape: bf16[3,256,256], index: 3, kind: input, shape index: {}]   ;;  %s3878_s4 = inlined_call_operand.vmem [shape: f32[1,256], index: 4, kind: input, shape index: {}]   ;;  %s3879_s5 = inlined_call_operand.hbm [shape: f32[8,32], index: 5, kind: output, shape index: {}]  }
   0x1   :  { %11 = vsyncpa [#allocation7], 0 }
   0x2   :  { %12 = vsyncpa [#allocation5], 0  ;;  %s3342_s18 = smov [#allocation6]   ;;  %s3248_s22 = scalar_lea.hbm %s3875_s1, 4608 }
   0x3   :  { %s30_s19 = sshll.u32 %s3342_s18, 4  ;;  %p3249_p0 = scmp.ne.s32.totalorder %s3875_s1, %s3248_s22  ;;  %s31_s19 = int_to_ptr.vmem [resolvable:$true] %s30_s19 }
   0x4   :  { %p3252_p1 = scmp.lt.u32.totalorder %s3248_s22, %s3875_s1 }
   0x6   :  { %p3254_p2 = pnand %p3252_p1, %p3249_p0 }
   0x8   :  { %3257 = shalt.err (!%p3254_p2)
}
   0x9   :  { %s3258_s27 = scalar_lea.vmem %s31_s19, 4608  ;;  %p3263_p4 = scmp.lt.s32.totalorder %s31_s19, %s31_s19 }
   0xa   :  { %p3259_p3 = scmp.ne.s32.totalorder %s31_s19, %s3258_s27  ;;  %p3264_p5 = scmp.lt.s32.totalorder %s3258_s27, %s3258_s27 }
   0xc   :  { %p3265_p6 = por %p3264_p5, %p3263_p4 }
   0xe   :  { %p3266_p7 = pnand %p3265_p6, %p3259_p3 }
  0x10   :  { %3269 = shalt.err (!%p3266_p7)
}
  0x11   :  { %s3343_s28 = smov 256   ;;  %s3344_s29 = smov 16  }
  0x12   :  { %36 = dma.hbm_to_vmem [thread:$0]  %s3875_s1, 4608, %s31_s19, [#allocation7], %s3343_s28, %s3343_s28, %s3344_s29  }
  0x13   :  { %s3345_s7 = smov [#allocation3]   ;;  %s3270_s11 = scalar_lea.hbm %s3874_s0, 1152 }
  0x14   :  { %s18_s8 = sshll.u32 %s3345_s7, 4  ;;  %p3271_p8 = scmp.ne.s32.totalorder %s3874_s0, %s3270_s11  ;;  %s19_s8 = int_to_ptr.vmem [resolvable:$true] %s18_s8 }
  0x15   :  { %p3274_p9 = scmp.lt.u32.totalorder %s3270_s11, %s3874_s0 }
  0x17   :  { %p3276_p10 = pnand %p3274_p9, %p3271_p8 }
  0x19   :  { %3279 = shalt.err (!%p3276_p10)
}
  0x1a   :  { %s3280_s16 = scalar_lea.vmem %s19_s8, 1152  ;;  %p3285_p12 = scmp.lt.s32.totalorder %s19_s8, %s19_s8 }
  0x1b   :  { %p3281_p11 = scmp.ne.s32.totalorder %s19_s8, %s3280_s16  ;;  %p3286_p13 = scmp.lt.s32.totalorder %s3280_s16, %s3280_s16 }
  0x1d   :  { %p3287_p0 = por %p3286_p13, %p3285_p12 }
  0x1f   :  { %p3288_p1 = pnand %p3287_p0, %p3281_p11 }
  0x21   :  { %3291 = shalt.err (!%p3288_p1)
}
  0x22   :  { %s3346_s1 = smov 64   ;;  %s3347_s17 = smov 4  }
  0x23   :  { %24 = dma.hbm_to_vmem [thread:$0]  %s3874_s0, 1152, %s19_s8, [#allocation4], %s3346_s1, %s3346_s1, %s3347_s17  }
  0x24   :  { %s3348_s20 = smov [#allocation8]   ;;  %s3292_s24 = scalar_lea.hbm %s3877_s3, 12288 }
  0x25   :  { %s44_s21 = sshll.u32 %s3348_s20, 4  ;;  %p3293_p2 = scmp.ne.s32.totalorder %s3877_s3, %s3292_s24  ;;  %s45_s21 = int_to_ptr.vmem [resolvable:$true] %s44_s21 }
  0x26   :  { %p3296_p3 = scmp.lt.u32.totalorder %s3292_s24, %s3877_s3 }
  0x28   :  { %p3298_p4 = pnand %p3296_p3, %p3293_p2 }
  0x2a   :  { %3301 = shalt.err (!%p3298_p4)
}
  0x2b   :  { %s3302_s29 = scalar_lea.vmem %s45_s21, 12288  ;;  %p3307_p6 = scmp.lt.s32.totalorder %s45_s21, %s45_s21 }
  0x2c   :  { %p3303_p5 = scmp.ne.s32.totalorder %s45_s21, %s3302_s29  ;;  %p3308_p7 = scmp.lt.s32.totalorder %s3302_s29, %s3302_s29 }
  0x2e   :  { %p3309_p8 = por %p3308_p7, %p3307_p6 }
  0x30   :  { %p3310_p9 = pnand %p3309_p8, %p3303_p5 }
  0x32   :  { %3313 = shalt.err (!%p3310_p9)
}
  0x33   :  { %s3349_s0 = smov 128   ;;  %s3350_s30 = smov 8  }
  0x34   :  { %50 = dma.hbm_to_vmem [thread:$0]  %s3877_s3, 12288, %s45_s21, [#allocation7], %s3349_s0, %s3349_s0, %s3350_s30  }
  0x35   :  { %3336 = dma.done.wait [#allocation4], 1152  }
  0x36   :  { %3337 = vsyncadd [#allocation4], 4294966144 }
  0x37   :  { %3338 = dma.done.wait [#allocation7], 16896  }
  0x38   :  { %3339 = vsyncadd [#allocation7], 4294950400  ;;  %v3351_v0 = vmov 0   ;;  %v3026_v1 = vld [vmem:[#allocation6 + $0x64] ss:$16 sps:$4 sm:$0xff]   ;;  %v3439_v13 = vld [vmem:[#allocation3 + $0x4] sm:$0xff]  }
  0x39   :  { %278 = vmatprep.mubr.bf16.mxu1 %v3351_v0  ;;  %628 = vmatprep.mubr.bf16.mxu0 %v3351_v0  ;;  %v3028_v2 = vld [vmem:[#allocation6 + $0x4] ss:$16 sps:$4 sm:$0xff]   ;;  %v3030_v3 = vld [vmem:[#allocation6 + $0x60] ss:$16 sps:$4 sm:$0xff]   ;;  %v3047_v14 = vld [vmem:[#allocation6 + $0x6c] ss:$16 sps:$4 sm:$0xff]  }
  0x3a   :  { %246 = vmatprep.subr.bf16.mxu1 %v3026_v1  ;;  %v3425_v4 = vld [vmem:[#allocation6] ss:$16 sps:$4 sm:$0xff]   ;;  %596 = vmatprep.subr.bf16.mxu0 %v3028_v2  ;;  %v3032_v5 = vld [vmem:[#allocation6 + $0x84] ss:$16 sps:$4 sm:$0xff]   ;;  %vm221_vm0 = vcmask 392192   ;;  %v3441_v15 = vld [vmem:[#allocation3] sm:$0xff]  }
  0x3b   :  { %247 = vmatpush1.bf16.msra.mxu1 %v3030_v3  ;;  %597 = vmatpush1.bf16.msra.mxu0 %v3425_v4  ;;  %v3428_v6 = vld [vmem:[#allocation6 + $0x24] ss:$16 sps:$4 sm:$0xff]   ;;  %v3036_v7 = vld [vmem:[#allocation6 + $0x80] ss:$16 sps:$4 sm:$0xff]   ;;  %v3045_v16 = vld [vmem:[#allocation6 + $0x68] ss:$16 sps:$4 sm:$0xff]  }
  0x3c   :  { %248 = vmatprep.subr.bf16.mxu1 %v3032_v5  ;;  %v3430_v8 = vld [vmem:[#allocation6 + $0x20] ss:$16 sps:$4 sm:$0xff]   ;;  %598 = vmatprep.subr.bf16.mxu0 %v3428_v6  ;;  %v3038_v9 = vld [vmem:[#allocation6 + $0xa4] ss:$16 sps:$4 sm:$0xff]   ;;  %v3053_v17 = vld [vmem:[#allocation6 + $0x88] ss:$16 sps:$4 sm:$0xff]  }
  0x3d   :  { %v3433_v10 = vld [vmem:[#allocation6 + $0x44] ss:$16 sps:$4 sm:$0xff]   ;;  %v3042_v11 = vld [vmem:[#allocation6 + $0xa0] ss:$16 sps:$4 sm:$0xff]   ;;  %v3055_v18 = vld [vmem:[#allocation6 + $0x8c] ss:$16 sps:$4 sm:$0xff]  }
  0x3e   :  { %v3436_v12 = vld [vmem:[#allocation6 + $0x40] ss:$16 sps:$4 sm:$0xff]   ;;  %v3450_v19 = vld [vmem:[#allocation3 + $0xc] sm:$0xff]   ;;  %v3070_v26 = vld [vmem:[#allocation6 + $0xac] ss:$16 sps:$4 sm:$0xff]   ;;  %s3353_s10 = smov 96  }
  0x3f   :  { %249 = vmatpush1.bf16.msra.mxu1 %v3036_v7  ;;  %599 = vmatpush1.bf16.msra.mxu0 %v3430_v8  ;;  %v3452_v20 = vld [vmem:[#allocation3 + $0x8] sm:$0xff]   ;;  %v3068_v25 = vld [vmem:[#allocation6 + $0xa8] ss:$16 sps:$4 sm:$0xff]   ;;  %v3460_v27 = vld [vmem:[#allocation3 + $0x14] sm:$0xff]   ;;  %s3354_s11 = smov [#allocation9]   ;;  %vm2571_vm1 = vcmask 261120  }
  0x40   :  { %250 = vmatprep.subr.bf16.mxu1 %v3038_v9  ;;  %600 = vmatprep.subr.bf16.mxu0 %v3433_v10  ;;  %v3062_v21 = vld [vmem:[#allocation6 + $0xc4] ss:$16 sps:$4 sm:$0xff]   ;;  %v3060_v22 = vld [vmem:[#allocation6 + $0xc0] ss:$16 sps:$4 sm:$0xff]   ;;  %v3462_v28 = vld [vmem:[#allocation3 + $0x10] sm:$0xff]   ;;  %s2579_s12 = sshll.u32 %s3354_s11, 4  ;;  %s2580_s12 = int_to_ptr.vmem [resolvable:$true] %s2579_s12 }
  0x41   :  { %v3065_v23 = vld [vmem:[#allocation6 + $0xe0] ss:$16 sps:$4 sm:$0xff]   ;;  %v3067_v24 = vld [vmem:[#allocation6 + $0xe4] ss:$16 sps:$4 sm:$0xff]   ;;  %v3477_v34 = vld [vmem:[#allocation3 + $0x20] sm:$0xff]   ;;  %s3314_s13 = scalar_lea.vmem %s2580_s12, 128  ;;  %p3319_p11 = scmp.lt.s32.totalorder %s2580_s12, %s2580_s12 }
  0x42   :  { %v3073_v29 = vld [vmem:[#allocation6 + $0x104] ss:$16 sps:$4 sm:$0xff]   ;;  %v3071_v30 = vld [vmem:[#allocation6 + $0x100] ss:$16 sps:$4 sm:$0xff]   ;;  %v3498_v40 = vld [vmem:[#allocation3 + $0x10] sm:$0xff]   ;;  %p3315_p10 = scmp.ne.s32.totalorder %s2580_s12, %s3314_s13  ;;  %p3320_p12 = scmp.lt.s32.totalorder %s3314_s13, %s3314_s13 }
  0x43   :  { %251 = vmatpush1.bf16.msra.mxu1 %v3042_v11  ;;  %601 = vmatpush1.bf16.msra.mxu0 %v3436_v12  ;;  %v3056_v31 = vld [vmem:[#allocation3 + $0x1c] sm:$0xff]   ;;  %v3058_v33 = vld [vmem:[#allocation3 + $0x24] sm:$0xff]   ;;  %v3063_v35 = vld [vmem:[#allocation3 + $0x2c] sm:$0xff]  }
  0x44   :  { %359 = vmatprep.subr.bf16.mxu1 %v3047_v14  ;;  %976 = vmatprep.subr.bf16.mxu0 %v3062_v21  ;;  %v3470_v32 = vld [vmem:[#allocation3 + $0x18] sm:$0xff]   ;;  %v3484_v36 = vld [vmem:[#allocation3 + $0x28] sm:$0xff]   ;;  %v3515_v42 = vld [vmem:[#allocation3 + $0x20] sm:$0xff]   ;;  %p3321_p13 = por %p3320_p12, %p3319_p11 }
  0x45   :  { %v3074_v37 = vld [vmem:[#allocation3 + $0x34] sm:$0xff]   ;;  %v3491_v38 = vld [vmem:[#allocation3 + $0x8] sm:$0xff]   ;;  %v3076_v39 = vld [vmem:[#allocation3 + $0x3c] sm:$0xff]  }
  0x46   :  { %2609 = vmatmul.mubr.msk.bf16.vlgmr.msra.gmra.mrb[0].mxu1 %vm221_vm0, %v3439_v13  ;;  %2645 = vmatmul.mubr.msk.bf16.vlgmr.msra.gmra.mrb[0].mxu0 %vm221_vm0, %v3441_v15  ;;  %v3505_v41 = vld [vmem:[#allocation3 + $0x18] sm:$0xff]   ;;  %v3085_v43 = vld [vmem:[#allocation6 + $0xc] ss:$16 sps:$4 sm:$0xff]   ;;  %v3526_v44 = vld [vmem:[#allocation3 + $0x28] sm:$0xff]   ;;  %p3322_p0 = pnand %p3321_p13, %p3315_p10 }
  0x47   :  { %360 = vmatpush1.bf16.msra.mxu1 %v3045_v16  ;;  %288 = vmatprep.mubr.bf16.mxu1 %v3351_v0  ;;  %v3534_v45 = vld [vmem:[#allocation3 + $0x30] sm:$0xff]   ;;  %v3541_v46 = vld [vmem:[#allocation3 + $0x38] sm:$0xff]   ;;  %v3548_v47 = vld [vmem:[#allocation3 + $0x40] sm:$0xff]  }
  0x48   :  { %638 = vmatprep.mubr.bf16.mxu0 %v3351_v0  ;;  %361 = vmatprep.subr.bf16.mxu1 %v3055_v18  ;;  %v3082_v48 = vld [vmem:[#allocation3 + $0x30] sm:$0xff]   ;;  %v3090_v53 = vld [vmem:[#allocation3 + $0x38] sm:$0xff]  }
  0x49   :  { %977 = vmatpush1.bf16.msra.mxu0 %v3060_v22  ;;  %v3083_v49 = vld [vmem:[#allocation6 + $0x8] ss:$16 sps:$4 sm:$0xff]   ;;  %v3089_v50 = vld [vmem:[#allocation6 + $0x2c] ss:$16 sps:$4 sm:$0xff]  }
  0x4a   :  { %978 = vmatprep.subr.bf16.mxu0 %v3067_v24  ;;  %v3087_v51 = vld [vmem:[#allocation6 + $0x28] ss:$16 sps:$4 sm:$0xff]   ;;  %v3094_v52 = vld [vmem:[#allocation6 + $0x4c] ss:$16 sps:$4 sm:$0xff]  }
  0x4b   :  { %362 = vmatpush1.bf16.msra.mxu1 %v3053_v17  ;;  %v3092_v54 = vld [vmem:[#allocation6 + $0x48] ss:$16 sps:$4 sm:$0xff]   ;;  %v3097_v55 = vld [vmem:[#allocation6 + $0xcc] ss:$16 sps:$4 sm:$0xff]  }
  0x4c   :  { %363 = vmatprep.subr.bf16.mxu1 %v3070_v26  ;;  %v3095_v56 = vld [vmem:[#allocation6 + $0xc8] ss:$16 sps:$4 sm:$0xff]   ;;  %v3100_v57 = vld [vmem:[#allocation6 + $0xec] ss:$16 sps:$4 sm:$0xff]  }
  0x4d   :  { %979 = vmatpush1.bf16.msra.mxu0 %v3065_v23  ;;  %v3098_v58 = vld [vmem:[#allocation6 + $0xe8] ss:$16 sps:$4 sm:$0xff]   ;;  %v3103_v59 = vld [vmem:[#allocation6 + $0x10c] ss:$16 sps:$4 sm:$0xff]  }
  0x4e   :  { %2610 = vmatmul.mubr.msk.bf16.gmra.mrb[4].mxu1 %vm221_vm0, %v3450_v19  ;;  %2646 = vmatmul.mubr.msk.bf16.gmra.mrb[4].mxu0 %vm221_vm0, %v3452_v20  ;;  %v3101_v60 = vld [vmem:[#allocation6 + $0x108] ss:$16 sps:$4 sm:$0xff]   ;;  %v3112_v14 = vld [vmem:[#allocation8 + $0x124] ss:$8 sps:$4 sm:$0xff]  }
  0x4f   :  { %298 = vmatprep.mubr.bf16.mxu1 %v3351_v0  ;;  %648 = vmatprep.mubr.bf16.mxu0 %v3351_v0  ;;  %v3104_v9 = vld [vmem:[#allocation8 + $0x100] ss:$8 sps:$4 sm:$0xff]   ;;  %v3113_v21 = vld [vmem:[#allocation8 + $0x130] ss:$8 sps:$4 sm:$0xff]   ;;  %v3118_v22 = vld [vmem:[#allocation8 + $0x144] ss:$8 sps:$4 sm:$0xff]  }
  0x50   :  { %364 = vmatpush1.bf16.msra.mxu1 %v3068_v25  ;;  %980 = vmatprep.subr.bf16.mxu0 %v3073_v29  ;;  %v3110_v17 = vld [vmem:[#allocation8 + $0x120] ss:$8 sps:$4 sm:$0xff]   ;;  %v1268_v29 = vlaneseq }
  0x51   :  { %2847 = vmatprep.subr.bf16.mxu1 %v3028_v2  ;;  %981 = vmatpush1.bf16.msra.mxu0 %v3071_v30  ;;  %v3116_v25 = vld [vmem:[#allocation8 + $0x140] ss:$8 sps:$4 sm:$0xff]   ;;  %v3119_v30 = vld [vmem:[#allocation8 + $0x150] ss:$8 sps:$4 sm:$0xff]  }
  0x56   :  { %2611 = vmatmul.mubr.msk.bf16.gmra.mrb[8].mxu1 %vm221_vm0, %v3460_v27  ;;  %2647 = vmatmul.mubr.msk.bf16.gmra.mrb[8].mxu0 %vm221_vm0, %v3462_v28 }
  0x57   :  { %308 = vmatprep.mubr.bf16.mxu1 %v3351_v0  ;;  %658 = vmatprep.mubr.bf16.mxu0 %v3351_v0 }
  0x5e   :  { %2612 = vmatmul.mubr.msk.bf16.gmra.mrb[12].mxu1 %vm221_vm0, %v3056_v31  ;;  %2648 = vmatmul.mubr.msk.bf16.gmra.mrb[12].mxu0 %vm221_vm0, %v3470_v32 }
  0x5f   :  { %318 = vmatprep.mubr.bf16.mxu1 %v3351_v0  ;;  %668 = vmatprep.mubr.bf16.mxu0 %v3351_v0 }
  0x66   :  { %2613 = vmatmul.mubr.msk.bf16.gmra.mrb[16].mxu1 %vm221_vm0, %v3058_v33  ;;  %2649 = vmatmul.mubr.msk.bf16.gmra.mrb[16].mxu0 %vm221_vm0, %v3477_v34 }
  0x67   :  { %328 = vmatprep.mubr.bf16.mxu1 %v3351_v0  ;;  %678 = vmatprep.mubr.bf16.mxu0 %v3351_v0 }
  0x6e   :  { %2614 = vmatmul.mubr.msk.bf16.gmra.mrb[20].mxu1 %vm221_vm0, %v3063_v35  ;;  %2650 = vmatmul.mubr.msk.bf16.gmra.mrb[20].mxu0 %vm221_vm0, %v3484_v36 }
  0x6f   :  { %338 = vmatprep.mubr.bf16.mxu1 %v3351_v0  ;;  %1008 = vmatprep.mubr.bf16.mxu0 %v3351_v0 }
  0x76   :  { %2615 = vmatmul.mubr.msk.bf16.gmra.mrb[24].mxu1 %vm221_vm0, %v3074_v37  ;;  %2681 = vmatmul.mubr.msk.bf16.vlgmr.msra.gmra.mrb[0].mxu0 %vm221_vm0, %v3491_v38 }
  0x77   :  { %348 = vmatprep.mubr.bf16.mxu1 %v3351_v0  ;;  %1018 = vmatprep.mubr.bf16.mxu0 %v3351_v0 }
  0x7e   :  { %2616 = vmatmul.mubr.msk.bf16.gmra.mrb[28].mxu1 %vm221_vm0, %v3076_v39  ;;  %2682 = vmatmul.mubr.msk.bf16.gmra.mrb[4].mxu0 %vm221_vm0, %v3498_v40 }
  0x7f   :  { %391 = vmatprep.mubr.bf16.mxu1 %v3351_v0  ;;  %1028 = vmatprep.mubr.bf16.mxu0 %v3351_v0 }
  0x86   :  { %2617 = vmatmul.mubr.msk.bf16.vlgmr.msra.gmra.mrb[32].mxu1 %vm221_vm0, %v3439_v13  ;;  %2683 = vmatmul.mubr.msk.bf16.gmra.mrb[8].mxu0 %vm221_vm0, %v3505_v41  ;;  %v3107_v13 = vld [vmem:[#allocation8 + $0x110] ss:$8 sps:$4 sm:$0xff]  }
  0x87   :  { %2850 = vmatpush1.bf16.msra.mxu1 %v3425_v4  ;;  %401 = vmatprep.mubr.bf16.mxu1 %v3351_v0 }
  0x88   :  { %1038 = vmatprep.mubr.bf16.mxu0 %v3351_v0  ;;  %2848 = vmatprep.subr.bf16.mxu1 %v3428_v6 }
  0x8b   :  { %2851 = vmatpush1.bf16.msra.mxu1 %v3430_v8 }
  0x8c   :  { %2849 = vmatprep.subr.bf16.mxu1 %v3433_v10  ;;  %v3106_v10 = vld [vmem:[#allocation8 + $0x104] ss:$8 sps:$4 sm:$0xff]  }
  0x8d   :  { %1821 = vmatprep.subr.bf16.mxu0 %v3106_v10 }
  0x8e   :  { %2618 = vmatmul.mubr.msk.bf16.gmra.mrb[36].mxu1 %vm221_vm0, %v3450_v19  ;;  %2684 = vmatmul.mubr.msk.bf16.gmra.mrb[12].mxu0 %vm221_vm0, %v3515_v42  ;;  %v3115_v19 = vld [vmem:[#allocation8 + $0x134] ss:$8 sps:$4 sm:$0xff]  }
  0x8f   :  { %411 = vmatprep.mubr.bf16.mxu1 %v3351_v0  ;;  %1048 = vmatprep.mubr.bf16.mxu0 %v3351_v0 }
  0x90   :  { %2852 = vmatpush1.bf16.msra.mxu1 %v3436_v12  ;;  %v3109_v12 = vld [vmem:[#allocation8 + $0x114] ss:$8 sps:$4 sm:$0xff]   ;;  %1822 = vmatpush1.bf16.msra.mxu0 %v3104_v9 }
  0x91   :  { %709 = vmatprep.subr.bf16.mxu1 %v3085_v43  ;;  %1823 = vmatprep.subr.bf16.mxu0 %v3109_v12  ;;  %v3130_v43 = vld [vmem:[#allocation8 + $0x184] ss:$8 sps:$4 sm:$0xff]  }
  0x94   :  { %1824 = vmatpush1.bf16.msra.mxu0 %v3107_v13 }
  0x95   :  { %1825 = vmatprep.subr.bf16.mxu0 %v3112_v14 }
  0x96   :  { %2619 = vmatmul.mubr.msk.bf16.gmra.mrb[40].mxu1 %vm221_vm0, %v3460_v27  ;;  %2685 = vmatmul.mubr.msk.bf16.gmra.mrb[16].mxu0 %vm221_vm0, %v3526_v44  ;;  %v3121_v27 = vld [vmem:[#allocation8 + $0x154] ss:$8 sps:$4 sm:$0xff]  }
  0x97   :  { %421 = vmatprep.mubr.bf16.mxu1 %v3351_v0  ;;  %1058 = vmatprep.mubr.bf16.mxu0 %v3351_v0 }
  0x98   :  { %1826 = vmatpush1.bf16.msra.mxu0 %v3110_v17 }
  0x99   :  { %1827 = vmatprep.subr.bf16.mxu0 %v3115_v19  ;;  %v3134_v19 = vld [vmem:[#allocation8 + $0x1a0] ss:$8 sps:$4 sm:$0xff]  }
  0x9c   :  { %1828 = vmatpush1.bf16.msra.mxu0 %v3113_v21 }
  0x9d   :  { %1829 = vmatprep.subr.bf16.mxu0 %v3118_v22 }
  0x9e   :  { %2620 = vmatmul.mubr.msk.bf16.gmra.mrb[44].mxu1 %vm221_vm0, %v3056_v31  ;;  %2686 = vmatmul.mubr.msk.bf16.gmra.mrb[20].mxu0 %vm221_vm0, %v3534_v45  ;;  %v3124_v31 = vld [vmem:[#allocation8 + $0x164] ss:$8 sps:$4 sm:$0xff]  }
  0x9f   :  { %431 = vmatprep.mubr.bf16.mxu1 %v3351_v0  ;;  %1068 = vmatprep.mubr.bf16.mxu0 %v3351_v0 }
  0xa0   :  { %1830 = vmatpush1.bf16.msra.mxu0 %v3116_v25 }
  0xa1   :  { %1831 = vmatprep.subr.bf16.mxu0 %v3121_v27 }
  0xa4   :  { %1832 = vmatpush1.bf16.msra.mxu0 %v3119_v30 }
  0xa5   :  { %1833 = vmatprep.subr.bf16.mxu0 %v3124_v31 }
  0xa6   :  { %2621 = vmatmul.mubr.msk.bf16.gmra.mrb[48].mxu1 %vm221_vm0, %v3058_v33  ;;  %2687 = vmatmul.mubr.msk.bf16.gmra.mrb[24].mxu0 %vm221_vm0, %v3541_v46 }
  0xa7   :  { %441 = vmatprep.mubr.bf16.mxu1 %v3351_v0  ;;  %1078 = vmatprep.mubr.bf16.mxu0 %v3351_v0 }
  0xae   :  { %2622 = vmatmul.mubr.msk.bf16.gmra.mrb[52].mxu1 %vm221_vm0, %v3063_v35  ;;  %2688 = vmatmul.mubr.msk.bf16.gmra.mrb[28].mxu0 %vm221_vm0, %v3548_v47  ;;  %v3122_v35 = vld [vmem:[#allocation8 + $0x160] ss:$8 sps:$4 sm:$0xff]  }
  0xaf   :  { %451 = vmatprep.mubr.bf16.mxu1 %v3351_v0  ;;  %1834 = vmatpush1.bf16.msra.mxu0 %v3122_v35 }
  0xb6   :  { %2623 = vmatmul.mubr.msk.bf16.gmra.mrb[56].mxu1 %vm221_vm0, %v3074_v37  ;;  %v3127_v37 = vld [vmem:[#allocation8 + $0x174] ss:$8 sps:$4 sm:$0xff]  }
  0xb7   :  { %461 = vmatprep.mubr.bf16.mxu1 %v3351_v0  ;;  %1835 = vmatprep.subr.bf16.mxu0 %v3127_v37 }
  0xbe   :  { %2624 = vmatmul.mubr.msk.bf16.gmra.mrb[60].mxu1 %vm221_vm0, %v3076_v39 }
  0xbf   :  { %688 = vmatprep.mubr.bf16.mxu1 %v3351_v0 }
  0xc6   :  { %2651 = vmatmul.mubr.msk.bf16.vlgmr.msra.gmra.mrb[24].mxu1 %vm221_vm0, %v3082_v48 }
  0xc7   :  { %710 = vmatpush1.bf16.msra.mxu1 %v3083_v49  ;;  %698 = vmatprep.mubr.bf16.mxu1 %v3351_v0 }
  0xc8   :  { %711 = vmatprep.subr.bf16.mxu1 %v3089_v50  ;;  %v3128_v50 = vld [vmem:[#allocation8 + $0x180] ss:$8 sps:$4 sm:$0xff]  }
  0xcb   :  { %712 = vmatpush1.bf16.msra.mxu1 %v3087_v51 }
  0xcc   :  { %713 = vmatprep.subr.bf16.mxu1 %v3094_v52 }
  0xce   :  { %2652 = vmatmul.mubr.msk.bf16.gmra.mrb[28].mxu1 %vm221_vm0, %v3090_v53 }
  0xcf   :  { %714 = vmatpush1.bf16.msra.mxu1 %v3092_v54  ;;  %741 = vmatprep.mubr.bf16.mxu1 %v3351_v0 }
  0xd0   :  { %1089 = vmatprep.subr.bf16.mxu1 %v3097_v55 }
  0xd6   :  { %2653 = vmatmul.mubr.msk.bf16.vlgmr.msra.gmra.mrb[32].mxu1 %vm221_vm0, %v3441_v15 }
  0xd7   :  { %1090 = vmatpush1.bf16.msra.mxu1 %v3095_v56  ;;  %751 = vmatprep.mubr.bf16.mxu1 %v3351_v0 }
  0xd8   :  { %1091 = vmatprep.subr.bf16.mxu1 %v3100_v57 }
  0xdb   :  { %1092 = vmatpush1.bf16.msra.mxu1 %v3098_v58 }
  0xdc   :  { %1093 = vmatprep.subr.bf16.mxu1 %v3103_v59 }
  0xde   :  { %2654 = vmatmul.mubr.msk.bf16.gmra.mrb[36].mxu1 %vm221_vm0, %v3452_v20 }
  0xdf   :  { %761 = vmatprep.mubr.bf16.mxu1 %v3351_v0  ;;  %1094 = vmatpush1.bf16.msra.mxu1 %v3101_v60  ;;  %v3131_v60 = vld [vmem:[#allocation8 + $0x190] ss:$8 sps:$4 sm:$0xff]  }
  0xe6   :  { %2655 = vmatmul.mubr.msk.bf16.gmra.mrb[40].mxu1 %vm221_vm0, %v3462_v28 }
  0xe7   :  { %771 = vmatprep.mubr.bf16.mxu1 %v3351_v0 }
  0xee   :  { %2656 = vmatmul.mubr.msk.bf16.gmra.mrb[44].mxu1 %vm221_vm0, %v3470_v32  ;;  %v3642_v32 = vshrl.u32 %v1268_v29, 7 }
  0xef   :  { %781 = vmatprep.mubr.bf16.mxu1 %v3351_v0 }
  0xf0   :  { %v1270_v39 = vsub.s32 0, %v3642_v32 }
  0xf6   :  { %2657 = vmatmul.mubr.msk.bf16.gmra.mrb[48].mxu1 %vm221_vm0, %v3477_v34 }
  0xf7   :  { %791 = vmatprep.mubr.bf16.mxu1 %v3351_v0 }
  0xfe   :  { %2658 = vmatmul.mubr.msk.bf16.gmra.mrb[52].mxu1 %vm221_vm0, %v3484_v36 }
  0xff   :  { %801 = vmatprep.mubr.bf16.mxu1 %v3351_v0 }
 0x106   :  { %2659 = vmatmul.mubr.msk.bf16.gmra.mrb[56].mxu1 %vm221_vm0, %v3082_v48 }
 0x107   :  { %811 = vmatprep.mubr.bf16.mxu1 %v3351_v0 }
 0x10e   :  { %2660 = vmatmul.mubr.msk.bf16.gmra.mrb[60].mxu1 %vm221_vm0, %v3090_v53  ;;  %v3133_v53 = vld [vmem:[#allocation8 + $0x194] ss:$8 sps:$4 sm:$0xff]  }
 0x10f   :  { %1121 = vmatprep.mubr.bf16.mxu1 %v3351_v0 }
 0x116   :  { %2689 = vmatmul.mubr.msk.bf16.vlgmr.msra.gmra.mrb[32].mxu1 %vm221_vm0, %v3491_v38 }
 0x117   :  { %1131 = vmatprep.mubr.bf16.mxu1 %v3351_v0 }
 0x119   :  { %v3587_v61 = vpop.f32.mrb[0].mxu1 }
 0x11a   :  { %v3589_v62 = vpop.f32.mrb[1].mxu1 }
 0x11b   :  { %v3591_v63 = vpop.f32.mrb[2].mxu1 }
 0x11c   :  { %v3593_v1 = vpop.f32.mrb[3].mxu1 }
 0x11e   :  { %2690 = vmatmul.mubr.msk.bf16.gmra.mrb[36].mxu1 %vm221_vm0, %v3498_v40  ;;  %v3656_v40 = vld [vmem:[%s3876_s2] sm:$0xf] }
 0x11f   :  { %1141 = vmatprep.mubr.bf16.mxu1 %v3351_v0 }
 0x121   :  { %v3598_v2 = vpop.f32.mrb[4].mxu1 }
 0x122   :  { %v3600_v3 = vpop.f32.mrb[5].mxu1 }
 0x123   :  { %v3602_v4 = vpop.f32.mrb[6].mxu1 }
 0x124   :  { %v3604_v5 = vpop.f32.mrb[7].mxu1 }
 0x126   :  { %2691 = vmatmul.mubr.msk.bf16.gmra.mrb[40].mxu1 %vm221_vm0, %v3505_v41  ;;  %v1274_v41 = vsub.s32 1, %v3642_v32 }
 0x127   :  { %1151 = vmatprep.mubr.bf16.mxu1 %v3351_v0 }
 0x128   :  { %v3670_v48 = vrot.slane %v3656_v40, %v1274_v41 }
 0x129   :  { %v3609_v6 = vpop.f32.mrb[8].mxu1 }
 0x12a   :  { %v3611_v7 = vpop.f32.mrb[9].mxu1 }
 0x12b   :  { %v3613_v8 = vpop.f32.mrb[10].mxu1 }
 0x12c   :  { %v3615_v11 = vpop.f32.mrb[11].mxu1 }
 0x12e   :  { %2692 = vmatmul.mubr.msk.bf16.gmra.mrb[44].mxu1 %vm221_vm0, %v3515_v42  ;;  %v3125_v42 = vld [vmem:[#allocation8 + $0x170] ss:$8 sps:$4 sm:$0xff]  }
 0x12f   :  { %1161 = vmatprep.mubr.bf16.mxu1 %v3351_v0  ;;  %1836 = vmatpush1.bf16.msra.mxu0 %v3125_v42 }
 0x130   :  { %1837 = vmatprep.subr.bf16.mxu0 %v3130_v43 }
 0x131   :  { %v3620_v15 = vpop.f32.mrb[12].mxu1 }
 0x132   :  { %v3622_v16 = vpop.f32.mrb[13].mxu1 }
 0x133   :  { %v3624_v18 = vpop.f32.mrb[14].mxu1  ;;  %1838 = vmatpush1.bf16.msra.mxu0 %v3128_v50 }
 0x134   :  { %v3626_v20 = vpop.f32.mrb[15].mxu1  ;;  %1839 = vmatprep.subr.bf16.mxu0 %v3133_v53 }
 0x136   :  { %2693 = vmatmul.mubr.msk.bf16.gmra.mrb[48].mxu1 %vm221_vm0, %v3526_v44  ;;  %v3665_v44 = vrot.slane %v3656_v40, %v1270_v39 }
 0x137   :  { %1171 = vmatprep.mubr.bf16.mxu1 %v3351_v0  ;;  %1840 = vmatpush1.bf16.msra.mxu0 %v3131_v60 }
 0x139   :  { %v3631_v23 = vpop.f32.mrb[16].mxu1 }
 0x13a   :  { %v3633_v24 = vpop.f32.mrb[17].mxu1 }
 0x13b   :  { %v3635_v26 = vpop.f32.mrb[18].mxu1 }
 0x13c   :  { %v3637_v28 = vpop.f32.mrb[19].mxu1 }
 0x13e   :  { %2694 = vmatmul.mubr.msk.bf16.gmra.mrb[52].mxu1 %vm221_vm0, %v3534_v45 }
 0x13f   :  { %1181 = vmatprep.mubr.bf16.mxu1 %v3351_v0 }
 0x141   :  { %v3644_v33 = vpop.f32.mrb[20].mxu1 }
 0x142   :  { %v3646_v34 = vpop.f32.mrb[21].mxu1 }
 0x143   :  { %v3648_v36 = vpop.f32.mrb[22].mxu1 }
 0x144   :  { %v3650_v38 = vpop.f32.mrb[23].mxu1 }
 0x146   :  { %2695 = vmatmul.mubr.msk.bf16.gmra.mrb[56].mxu1 %vm221_vm0, %v3541_v46 }
 0x147   :  { %1191 = vmatprep.mubr.bf16.mxu1 %v3351_v0 }
 0x149   :  { %v1010_v45 = vpop.f32.mrb[0].mxu0 }
 0x14a   :  { %v2853_v49 = vadd.f32 %v1010_v45, %v3587_v61  ;;  %v1012_v46 = vpop.f32.mrb[1].mxu0 }
 0x14b   :  { %v2854_v51 = vadd.f32 %v1012_v46, %v3589_v62  ;;  %v1014_v52 = vpop.f32.mrb[2].mxu0  ;;  %v3136_v62 = vld [vmem:[#allocation8 + $0x1a4] ss:$8 sps:$4 sm:$0xff]  }
 0x14c   :  { %v1288_v54 = vadd.f32 %v2853_v49, %v3665_v44  ;;  %v2855_v55 = vadd.f32 %v1014_v52, %v3591_v63  ;;  %v1016_v56 = vpop.f32.mrb[3].mxu0  ;;  %1841 = vmatprep.subr.bf16.mxu0 %v3136_v62 }
 0x14d   :  { %v1289_v57 = vadd.f32 %v2854_v51, %v3670_v48  ;;  %v2856_v58 = vadd.f32 %v1016_v56, %v3593_v1  ;;  %1842 = vmatpush1.bf16.msra.mxu0 %v3134_v19 }
 0x14e   :  { %v1292_v59 = vadd.f32 %v2855_v55, %v3665_v44  ;;  %2696 = vmatmul.mubr.msk.bf16.gmra.mrb[60].mxu1 %vm221_vm0, %v3548_v47  ;;  %v1352_v9 = vmax.f32 %v1288_v54, 0.0 }
 0x14f   :  { %v1293_v61 = vadd.f32 %v2856_v58, %v3670_v48  ;;  %v1353_v12 = vmax.f32 %v1289_v57, 0.0 }
 0x150   :  { %v1356_v10 = vmax.f32 %v1292_v59, 0.0 }
 0x151   :  { %v1357_v63 = vmax.f32 %v1293_v61, 0.0  ;;  %v1020_v13 = vpop.f32.mrb[4].mxu0 }
 0x152   :  { %v3682_v14 = vmax.f32 %v1352_v9, %v1356_v10  ;;  %v2857_v1 = vadd.f32 %v1020_v13, %v3598_v2  ;;  %v1022_v17 = vpop.f32.mrb[5].mxu0 }
 0x153   :  { %v3685_v21 = vmax.f32 %v1353_v12, %v1357_v63  ;;  %v2858_v47 = vadd.f32 %v1022_v17, %v3600_v3  ;;  %v1024_v22 = vpop.f32.mrb[6].mxu0 }
 0x154   :  { %v1296_v25 = vadd.f32 %v2857_v1, %v3665_v44  ;;  %v2859_v27 = vadd.f32 %v1024_v22, %v3602_v4  ;;  %v1026_v29 = vpop.f32.mrb[7].mxu0 }
 0x155   :  { %v1297_v30 = vadd.f32 %v2858_v47, %v3670_v48  ;;  %v2860_v31 = vadd.f32 %v1026_v29, %v3604_v5 }
 0x156   :  { %v1300_v2 = vadd.f32 %v2859_v27, %v3665_v44  ;;  %v1360_v37 = vmax.f32 %v1296_v25, 0.0 }
 0x157   :  { %v1301_v35 = vadd.f32 %v2860_v31, %v3670_v48  ;;  %v1361_v43 = vmax.f32 %v1297_v30, 0.0 }
 0x158   :  { %v1364_v42 = vmax.f32 %v1300_v2, 0.0 }
 0x159   :  { %v1365_v3 = vmax.f32 %v1301_v35, 0.0  ;;  %v1030_v45 = vpop.f32.mrb[8].mxu0  ;;  %v3137_v35 = vld [vmem:[#allocation8 + $0x1b0] ss:$8 sps:$4 sm:$0xff]  }
 0x15a   :  { %v3694_v49 = vmax.f32 %v1360_v37, %v1364_v42  ;;  %v2861_v46 = vadd.f32 %v1030_v45, %v3609_v6  ;;  %v1032_v4 = vpop.f32.mrb[9].mxu0 }
 0x15b   :  { %v3697_v50 = vmax.f32 %v1361_v43, %v1365_v3  ;;  %v2862_v51 = vadd.f32 %v1032_v4, %v3611_v7  ;;  %v1034_v5 = vpop.f32.mrb[10].mxu0 }
 0x15c   :  { %v1304_v52 = vadd.f32 %v2861_v46, %v3665_v44  ;;  %v2863_v53 = vadd.f32 %v1034_v5, %v3613_v8  ;;  %v1036_v54 = vpop.f32.mrb[11].mxu0  ;;  %v3140_v5 = vld [vmem:[#allocation8 + $0x1c0] ss:$8 sps:$4 sm:$0xff]  }
 0x15d   :  { %v1305_v55 = vadd.f32 %v2862_v51, %v3670_v48  ;;  %v2864_v56 = vadd.f32 %v1036_v54, %v3615_v11  ;;  %v3142_v51 = vld [vmem:[#allocation8 + $0x1c4] ss:$8 sps:$4 sm:$0xff]  }
 0x15e   :  { %v1308_v57 = vadd.f32 %v2863_v53, %v3665_v44  ;;  %v1368_v6 = vmax.f32 %v1304_v52, 0.0 }
 0x15f   :  { %v1309_v58 = vadd.f32 %v2864_v56, %v3670_v48  ;;  %v1369_v60 = vmax.f32 %v1305_v55, 0.0 }
 0x160   :  { %v1372_v59 = vmax.f32 %v1308_v57, 0.0 }
 0x161   :  { %v1373_v61 = vmax.f32 %v1309_v58, 0.0  ;;  %v1040_v62 = vpop.f32.mrb[12].mxu0 }
 0x162   :  { %v3706_v7 = vmax.f32 %v1368_v6, %v1372_v59  ;;  %v2865_v9 = vadd.f32 %v1040_v62, %v3620_v15  ;;  %v1042_v10 = vpop.f32.mrb[13].mxu0 }
 0x163   :  { %v3709_v8 = vmax.f32 %v1369_v60, %v1373_v61  ;;  %v2866_v12 = vadd.f32 %v1042_v10, %v3622_v16  ;;  %v1044_v63 = vpop.f32.mrb[14].mxu0  ;;  %v3139_v16 = vld [vmem:[#allocation8 + $0x1b4] ss:$8 sps:$4 sm:$0xff]  }
 0x164   :  { %v1312_v11 = vadd.f32 %v2865_v9, %v3665_v44  ;;  %v2867_v13 = vadd.f32 %v1044_v63, %v3624_v18  ;;  %v1046_v1 = vpop.f32.mrb[15].mxu0  ;;  %1843 = vmatprep.subr.bf16.mxu0 %v3139_v16  ;;  %v3154_v16 = vld [vmem:[#allocation8 + $0x4] ss:$8 sps:$4 sm:$0xff]  }
 0x165   :  { %v1313_v17 = vadd.f32 %v2866_v12, %v3670_v48  ;;  %v2868_v19 = vadd.f32 %v1046_v1, %v3626_v20  ;;  %1844 = vmatpush1.bf16.msra.mxu0 %v3137_v35 }
 0x166   :  { %v1316_v47 = vadd.f32 %v2867_v13, %v3665_v44  ;;  %v1376_v15 = vmax.f32 %v1312_v11, 0.0  ;;  %1845 = vmatprep.subr.bf16.mxu0 %v3142_v51  ;;  %v3148_v11 = vld [vmem:[#allocation8 + $0x1e4] ss:$8 sps:$4 sm:$0xff]   ;;  %v3146_v13 = vld [vmem:[#allocation8 + $0x1e0] ss:$8 sps:$4 sm:$0xff]  }
 0x167   :  { %v1317_v22 = vadd.f32 %v2868_v19, %v3670_v48  ;;  %v1377_v27 = vmax.f32 %v1313_v17, 0.0 }
 0x168   :  { %v1380_v25 = vmax.f32 %v1316_v47, 0.0 }
 0x169   :  { %v1381_v29 = vmax.f32 %v1317_v22, 0.0  ;;  %v1050_v30 = vpop.f32.mrb[16].mxu0  ;;  %1846 = vmatpush1.bf16.msra.mxu0 %v3140_v5 }
 0x16a   :  { %v3718_v31 = vmax.f32 %v1376_v15, %v1380_v25  ;;  %v2869_v2 = vadd.f32 %v1050_v30, %v3631_v23  ;;  %v1052_v18 = vpop.f32.mrb[17].mxu0 }
 0x16b   :  { %v3721_v37 = vmax.f32 %v1377_v27, %v1381_v29  ;;  %v2870_v20 = vadd.f32 %v1052_v18, %v3633_v24  ;;  %v1054_v42 = vpop.f32.mrb[18].mxu0  ;;  %v3149_v27 = vld [vmem:[#allocation8 + $0x1f0] ss:$8 sps:$4 sm:$0xff]  }
 0x16c   :  { %v1320_v43 = vadd.f32 %v2869_v2, %v3665_v44  ;;  %v2871_v3 = vadd.f32 %v1054_v42, %v3635_v26  ;;  %v1056_v45 = vpop.f32.mrb[19].mxu0  ;;  %v3145_v26 = vld [vmem:[#allocation8 + $0x1d4] ss:$8 sps:$4 sm:$0xff]  }
 0x16d   :  { %v1321_v46 = vadd.f32 %v2870_v20, %v3670_v48  ;;  %v2872_v4 = vadd.f32 %v1056_v45, %v3637_v28  ;;  %v3143_v28 = vld [vmem:[#allocation8 + $0x1d0] ss:$8 sps:$4 sm:$0xff]   ;;  %1847 = vmatprep.subr.bf16.mxu0 %v3145_v26 }
 0x16e   :  { %v1324_v23 = vadd.f32 %v2871_v3, %v3665_v44  ;;  %v1384_v24 = vmax.f32 %v1320_v43, 0.0  ;;  %1848 = vmatpush1.bf16.msra.mxu0 %v3143_v28 }
 0x16f   :  { %v1325_v52 = vadd.f32 %v2872_v4, %v3670_v48  ;;  %v1385_v54 = vmax.f32 %v1321_v46, 0.0  ;;  %1849 = vmatprep.subr.bf16.mxu0 %v3148_v11 }
 0x170   :  { %v1388_v53 = vmax.f32 %v1324_v23, 0.0 }
 0x171   :  { %v1389_v55 = vmax.f32 %v1325_v52, 0.0  ;;  %v1060_v56 = vpop.f32.mrb[20].mxu0 }
 0x172   :  { %v3730_v57 = vmax.f32 %v1384_v24, %v1388_v53  ;;  %v2873_v58 = vadd.f32 %v1060_v56, %v3644_v33  ;;  %v1062_v6 = vpop.f32.mrb[21].mxu0  ;;  %1850 = vmatpush1.bf16.msra.mxu0 %v3146_v13 }
 0x173   :  { %v3733_v59 = vmax.f32 %v1385_v54, %v1389_v55  ;;  %v2874_v60 = vadd.f32 %v1062_v6, %v3646_v34  ;;  %v1064_v61 = vpop.f32.mrb[22].mxu0 }
 0x174   :  { %v1328_v62 = vadd.f32 %v2873_v58, %v3665_v44  ;;  %v2875_v9 = vadd.f32 %v1064_v61, %v3648_v36  ;;  %v1066_v10 = vpop.f32.mrb[23].mxu0  ;;  %v3151_v36 = vld [vmem:[#allocation8 + $0x1f4] ss:$8 sps:$4 sm:$0xff]  }
 0x175   :  { %v1329_v12 = vadd.f32 %v2874_v60, %v3670_v48  ;;  %v2876_v63 = vadd.f32 %v1066_v10, %v3650_v38  ;;  %1851 = vmatprep.subr.bf16.mxu0 %v3151_v36 }
 0x176   :  { %v1332_v33 = vadd.f32 %v2875_v9, %v3665_v44  ;;  %v1392_v34 = vmax.f32 %v1328_v62, 0.0  ;;  %1852 = vmatpush1.bf16.msra.mxu0 %v3149_v27  ;;  %v1282_v27 = vsub.s32 3, %v3642_v32 }
 0x177   :  { %v1333_v1 = vadd.f32 %v2876_v63, %v3670_v48  ;;  %v1393_v19 = vmax.f32 %v1329_v12, 0.0  ;;  %2094 = vmatprep.subr.bf16.mxu0 %v3154_v16 }
 0x178   :  { %v1396_v17 = vmax.f32 %v1332_v33, 0.0 }
 0x179   :  { %v1397_v47 = vmax.f32 %v1333_v1, 0.0  ;;  %v1070_v22 = vpop.f32.mrb[24].mxu0 }
 0x17a   :  { %v3742_v15 = vmax.f32 %v1392_v34, %v1396_v17  ;;  %v1072_v25 = vpop.f32.mrb[25].mxu0 }
 0x17b   :  { %v3744_v29 = vmax.f32 %v1393_v19, %v1397_v47  ;;  %v1074_v38 = vpop.f32.mrb[26].mxu0 }
 0x17c   :  { %v1076_v30 = vpop.f32.mrb[27].mxu0 }
 0x181   :  { %v1080_v2 = vpop.f32.mrb[28].mxu0 }
 0x182   :  { %v1082_v18 = vpop.f32.mrb[29].mxu0 }
 0x183   :  { %v1084_v35 = vpop.f32.mrb[30].mxu0 }
 0x184   :  { %v1086_v20 = vpop.f32.mrb[31].mxu0 }
 0x199   :  { %v690_v42 = vpop.f32.mrb[24].mxu1 }
 0x19a   :  { %v2877_v43 = vadd.f32 %v1070_v22, %v690_v42  ;;  %v692_v3 = vpop.f32.mrb[25].mxu1 }
 0x19b   :  { %v2878_v45 = vadd.f32 %v1072_v25, %v692_v3  ;;  %v694_v46 = vpop.f32.mrb[26].mxu1  ;;  %v1278_v25 = vsub.s32 2, %v3642_v32 }
 0x19c   :  { %v1336_v4 = vadd.f32 %v2877_v43, %v3665_v44  ;;  %v2879_v51 = vadd.f32 %v1074_v38, %v694_v46  ;;  %v696_v23 = vpop.f32.mrb[27].mxu1 }
 0x19d   :  { %v1337_v5 = vadd.f32 %v2878_v45, %v3670_v48  ;;  %v2880_v52 = vadd.f32 %v1076_v30, %v696_v23  ;;  %v3765_v38 = vrot.slane %v3656_v40, %v1278_v25  ;;  %v3768_v30 = vrot.slane %v3656_v40, %v1282_v27  ;;  %v3152_v27 = vld [vmem:[#allocation8] ss:$8 sps:$4 sm:$0xff]  }
 0x19e   :  { %v1340_v24 = vadd.f32 %v2879_v51, %v3665_v44  ;;  %v1400_v54 = vmax.f32 %v1336_v4, 0.0 }
 0x19f   :  { %v1341_v53 = vadd.f32 %v2880_v52, %v3670_v48  ;;  %v1401_v56 = vmax.f32 %v1337_v5, 0.0 }
 0x1a0   :  { %v1404_v55 = vmax.f32 %v1340_v24, 0.0 }
 0x1a1   :  { %v1405_v26 = vmax.f32 %v1341_v53, 0.0  ;;  %v700_v58 = vpop.f32.mrb[28].mxu1 }
 0x1a2   :  { %v3750_v6 = vmax.f32 %v1400_v54, %v1404_v55  ;;  %v2881_v28 = vadd.f32 %v1080_v2, %v700_v58  ;;  %v702_v60 = vpop.f32.mrb[29].mxu1 }
 0x1a3   :  { %v3752_v61 = vmax.f32 %v1401_v56, %v1405_v26  ;;  %v2882_v62 = vadd.f32 %v1082_v18, %v702_v60  ;;  %v704_v9 = vpop.f32.mrb[30].mxu1 }
 0x1a4   :  { %v1344_v10 = vadd.f32 %v2881_v28, %v3665_v44  ;;  %v2883_v12 = vadd.f32 %v1084_v35, %v704_v9  ;;  %v706_v63 = vpop.f32.mrb[31].mxu1 }
 0x1a5   :  { %v1345_v11 = vadd.f32 %v2882_v62, %v3670_v48  ;;  %v2884_v33 = vadd.f32 %v1086_v20, %v706_v63 }
 0x1a6   :  { %v1348_v13 = vadd.f32 %v2883_v12, %v3665_v44  ;;  %v1408_v34 = vmax.f32 %v1344_v10, 0.0 }
 0x1a7   :  { %v1349_v1 = vadd.f32 %v2884_v33, %v3670_v48  ;;  %v1409_v19 = vmax.f32 %v1345_v11, 0.0 }
 0x1a8   :  { %v1412_v17 = vmax.f32 %v1348_v13, 0.0 }
 0x1a9   :  { %v1413_v47 = vmax.f32 %v1349_v1, 0.0 }
 0x1aa   :  { %v3758_v22 = vmax.f32 %v1408_v34, %v1412_v17 }
 0x1ab   :  { %v3760_v36 = vmax.f32 %v1409_v19, %v1413_v47 }
 0x1e9   :  { %v1123_v44 = vpop.f32.mrb[32].mxu1 }
 0x1ea   :  { %v1290_v48 = vadd.f32 %v3765_v38, %v1123_v44  ;;  %v1125_v16 = vpop.f32.mrb[33].mxu1 }
 0x1eb   :  { %v1291_v2 = vadd.f32 %v3768_v30, %v1125_v16  ;;  %v1127_v18 = vpop.f32.mrb[34].mxu1  ;;  %v3157_v16 = vld [vmem:[#allocation8 + $0x14] ss:$8 sps:$4 sm:$0xff]  }
 0x1ec   :  { %v1294_v35 = vadd.f32 %v3765_v38, %v1127_v18  ;;  %v1129_v20 = vpop.f32.mrb[35].mxu1  ;;  %v1354_v43 = vmax.f32 %v1290_v48, 0.0 }
 0x1ed   :  { %v1295_v42 = vadd.f32 %v3768_v30, %v1129_v20  ;;  %v1355_v45 = vmax.f32 %v1291_v2, 0.0  ;;  %v3155_v20 = vld [vmem:[#allocation8 + $0x10] ss:$8 sps:$4 sm:$0xff]  }
 0x1ee   :  { %v1358_v3 = vmax.f32 %v1294_v35, 0.0 }
 0x1ef   :  { %v1359_v46 = vmax.f32 %v1295_v42, 0.0 }
 0x1f0   :  { %v1418_v4 = vmax.f32 %v1354_v43, %v1358_v3 }
 0x1f1   :  { %v1419_v51 = vmax.f32 %v1355_v45, %v1359_v46  ;;  %v1133_v40 = vpop.f32.mrb[36].mxu1  ;;  %v3160_v45 = vld [vmem:[#allocation8 + $0x24] ss:$8 sps:$4 sm:$0xff]  }
 0x1f2   :  { %v1448_v23 = vmax.f32 %v3682_v14, %v1418_v4  ;;  %v1298_v5 = vadd.f32 %v3765_v38, %v1133_v40  ;;  %v1135_v52 = vpop.f32.mrb[37].mxu1 }
 0x1f3   :  { %v1449_v24 = vmax.f32 %v3685_v21, %v1419_v51  ;;  %v1299_v53 = vadd.f32 %v3768_v30, %v1135_v52  ;;  %v1137_v54 = vpop.f32.mrb[38].mxu1 }
 0x1f4   :  { %v1302_v55 = vadd.f32 %v3765_v38, %v1137_v54  ;;  %v1139_v56 = vpop.f32.mrb[39].mxu1  ;;  %v1362_v28 = vmax.f32 %v1298_v5, 0.0 }
 0x1f5   :  { %v1303_v26 = vadd.f32 %v3768_v30, %v1139_v56  ;;  %v3780_v58 = vpack.c.bf16 %v1449_v24, %v1448_v23  ;;  %v1363_v62 = vmax.f32 %v1299_v53, 0.0 }
 0x1f6   :  { %v1366_v60 = vmax.f32 %v1302_v55, 0.0  ;;  %v3163_v55 = vld [vmem:[#allocation8 + $0x34] ss:$8 sps:$4 sm:$0xff]  }
 0x1f7   :  { %v1367_v9 = vmax.f32 %v1303_v26, 0.0 }
 0x1f8   :  { %v1422_v14 = vmax.f32 %v1362_v28, %v1366_v60 }
 0x1f9   :  { %v1423_v10 = vmax.f32 %v1363_v62, %v1367_v9  ;;  %v1143_v12 = vpop.f32.mrb[40].mxu1  ;;  %v3161_v62 = vld [vmem:[#allocation8 + $0x30] ss:$8 sps:$4 sm:$0xff]  }
 0x1fa   :  { %v1450_v63 = vmax.f32 %v3694_v49, %v1422_v14  ;;  %v1306_v21 = vadd.f32 %v3765_v38, %v1143_v12  ;;  %v1145_v11 = vpop.f32.mrb[41].mxu1  ;;  %v3166_v12 = vld [vmem:[#allocation8 + $0x44] ss:$8 sps:$4 sm:$0xff]  }
 0x1fb   :  { %v1451_v33 = vmax.f32 %v3697_v50, %v1423_v10  ;;  %v1307_v13 = vadd.f32 %v3768_v30, %v1145_v11  ;;  %v1147_v1 = vpop.f32.mrb[42].mxu1 }
 0x1fc   :  { %v2833_v34 = vpack.c.bf16 %v1450_v63, %v1448_v23  ;;  %v1310_v17 = vadd.f32 %v3765_v38, %v1147_v1  ;;  %v1149_v19 = vpop.f32.mrb[43].mxu1  ;;  %v1370_v44 = vmax.f32 %v1306_v21, 0.0 }
 0x1fd   :  { %v1311_v47 = vadd.f32 %v3768_v30, %v1149_v19  ;;  %v2834_v25 = vpack.c.bf16 %v1451_v33, %v1449_v24  ;;  %v1371_v49 = vmax.f32 %v1307_v13, 0.0  ;;  %v3158_v24 = vld [vmem:[#allocation8 + $0x20] ss:$8 sps:$4 sm:$0xff]  }
 0x1fe   :  { %v1374_v48 = vmax.f32 %v1310_v17, 0.0  ;;  %v3164_v19 = vld [vmem:[#allocation8 + $0x40] ss:$8 sps:$4 sm:$0xff]  }
 0x1ff   :  { %v1375_v2 = vmax.f32 %v1311_v47, 0.0  ;;  %1853 = vmatprep.mubr.bf16.mxu0 %v2834_v25  ;;  %v3169_v25 = vld [vmem:[#allocation8 + $0x54] ss:$8 sps:$4 sm:$0xff]  }
 0x200   :  { %v1426_v18 = vmax.f32 %v1370_v44, %v1374_v48  ;;  %1854 = vmatmul.mubr.bf16.vlgmr.msra.gmra.mrb[32].mxu0 %v2833_v34 }
 0x201   :  { %v1427_v50 = vmax.f32 %v1371_v49, %v1375_v2  ;;  %2095 = vmatpush1.bf16.msra.mxu0 %v3152_v27  ;;  %v1153_v35 = vpop.f32.mrb[44].mxu1  ;;  %v3167_v49 = vld [vmem:[#allocation8 + $0x50] ss:$8 sps:$4 sm:$0xff]  }
 0x202   :  { %v1452_v42 = vmax.f32 %v3706_v7, %v1426_v18  ;;  %v1314_v43 = vadd.f32 %v3765_v38, %v1153_v35  ;;  %v1155_v3 = vpop.f32.mrb[45].mxu1  ;;  %2096 = vmatprep.subr.bf16.mxu0 %v3157_v16  ;;  %v3172_v35 = vld [vmem:[#allocation8 + $0x64] ss:$8 sps:$4 sm:$0xff]  }
 0x203   :  { %v1453_v46 = vmax.f32 %v3709_v8, %v1427_v50  ;;  %v1315_v4 = vadd.f32 %v3768_v30, %v1155_v3  ;;  %v1157_v51 = vpop.f32.mrb[46].mxu1 }
 0x204   :  { %v1318_v40 = vadd.f32 %v3765_v38, %v1157_v51  ;;  %v1159_v23 = vpop.f32.mrb[47].mxu1  ;;  %v3793_v5 = vpack.c.bf16 %v1452_v42, %v1450_v63  ;;  %v1378_v53 = vmax.f32 %v1314_v43, 0.0  ;;  %v3170_v51 = vld [vmem:[#allocation8 + $0x60] ss:$8 sps:$4 sm:$0xff]  }
 0x205   :  { %v1319_v52 = vadd.f32 %v3768_v30, %v1159_v23  ;;  %2097 = vmatpush1.bf16.msra.mxu0 %v3155_v20  ;;  %v3796_v7 = vpack.c.bf16 %v1453_v46, %v1451_v33  ;;  %v1379_v56 = vmax.f32 %v1315_v4, 0.0 }
 0x206   :  { %v1382_v54 = vmax.f32 %v1318_v40, 0.0  ;;  %2098 = vmatprep.subr.bf16.mxu0 %v3160_v45 }
 0x207   :  { %v1383_v8 = vmax.f32 %v1319_v52, 0.0  ;;  %v3175_v52 = vld [vmem:[#allocation8 + $0x74] ss:$8 sps:$4 sm:$0xff]  }
 0x208   :  { %v1430_v26 = vmax.f32 %v1378_v53, %v1382_v54 }
 0x209   :  { %v1431_v28 = vmax.f32 %v1379_v56, %v1383_v8  ;;  %2099 = vmatpush1.bf16.msra.mxu0 %v3158_v24  ;;  %v1163_v60 = vpop.f32.mrb[48].mxu1  ;;  %v3173_v56 = vld [vmem:[#allocation8 + $0x70] ss:$8 sps:$4 sm:$0xff]  }
 0x20a   :  { %v1454_v9 = vmax.f32 %v3718_v31, %v1430_v26  ;;  %v1322_v14 = vadd.f32 %v3765_v38, %v1163_v60  ;;  %v1165_v10 = vpop.f32.mrb[49].mxu1  ;;  %2100 = vmatprep.subr.bf16.mxu0 %v3163_v55  ;;  %v3178_v60 = vld [vmem:[#allocation8 + $0x84] ss:$8 sps:$4 sm:$0xff]  }
 0x20b   :  { %v1455_v63 = vmax.f32 %v3721_v37, %v1431_v28  ;;  %v1323_v21 = vadd.f32 %v3768_v30, %v1165_v10  ;;  %v1167_v11 = vpop.f32.mrb[50].mxu1 }
 0x20c   :  { %v1326_v33 = vadd.f32 %v3765_v38, %v1167_v11  ;;  %v1169_v13 = vpop.f32.mrb[51].mxu1  ;;  %v2835_v1 = vpack.c.bf16 %v1454_v9, %v1452_v42  ;;  %v1386_v31 = vmax.f32 %v1322_v14, 0.0 }
 0x20d   :  { %v1327_v34 = vadd.f32 %v3768_v30, %v1169_v13  ;;  %2101 = vmatpush1.bf16.msra.mxu0 %v3161_v62  ;;  %v2836_v17 = vpack.c.bf16 %v1455_v63, %v1453_v46  ;;  %v1387_v27 = vmax.f32 %v1323_v21, 0.0 }
 0x20e   :  { %v1390_v47 = vmax.f32 %v1326_v33, 0.0  ;;  %2102 = vmatprep.subr.bf16.mxu0 %v3166_v12  ;;  %v3176_v33 = vld [vmem:[#allocation8 + $0x80] ss:$8 sps:$4 sm:$0xff]  }
 0x20f   :  { %v1391_v44 = vmax.f32 %v1327_v34, 0.0  ;;  %1863 = vmatprep.mubr.bf16.mxu0 %v2836_v17 }
 0x210   :  { %v1434_v37 = vmax.f32 %v1386_v31, %v1390_v47  ;;  %1864 = vmatmul.mubr.bf16.gmra.mrb[36].mxu0 %v2835_v1  ;;  %v3181_v1 = vld [vmem:[#allocation8 + $0x94] ss:$8 sps:$4 sm:$0xff]   ;;  %v3179_v47 = vld [vmem:[#allocation8 + $0x90] ss:$8 sps:$4 sm:$0xff]  }
 0x211   :  { %v1435_v48 = vmax.f32 %v1387_v27, %v1391_v44  ;;  %2103 = vmatpush1.bf16.msra.mxu0 %v3164_v19  ;;  %v1173_v16 = vpop.f32.mrb[52].mxu1 }
 0x212   :  { %v1456_v2 = vmax.f32 %v3730_v57, %v1434_v37  ;;  %v1330_v18 = vadd.f32 %v3765_v38, %v1173_v16  ;;  %v1175_v50 = vpop.f32.mrb[53].mxu1  ;;  %2104 = vmatprep.subr.bf16.mxu0 %v3169_v25  ;;  %v3184_v37 = vld [vmem:[#allocation8 + $0xa4] ss:$8 sps:$4 sm:$0xff]  }
 0x213   :  { %v1457_v20 = vmax.f32 %v3733_v59, %v1435_v48  ;;  %v1331_v42 = vadd.f32 %v3768_v30, %v1175_v50  ;;  %v1177_v43 = vpop.f32.mrb[54].mxu1 }
 0x214   :  { %v1334_v3 = vadd.f32 %v3765_v38, %v1177_v43  ;;  %v1179_v45 = vpop.f32.mrb[55].mxu1  ;;  %v3809_v46 = vpack.c.bf16 %v1456_v2, %v1454_v9  ;;  %v1394_v40 = vmax.f32 %v1330_v18, 0.0 }
 0x215   :  { %v1335_v4 = vadd.f32 %v3768_v30, %v1179_v45  ;;  %2105 = vmatpush1.bf16.msra.mxu0 %v3167_v49  ;;  %v3812_v57 = vpack.c.bf16 %v1457_v20, %v1455_v63  ;;  %v1395_v24 = vmax.f32 %v1331_v42, 0.0 }
 0x216   :  { %v1398_v23 = vmax.f32 %v1334_v3, 0.0  ;;  %2106 = vmatprep.subr.bf16.mxu0 %v3172_v35  ;;  %v3187_v3 = vld [vmem:[#allocation8 + $0xb4] ss:$8 sps:$4 sm:$0xff]  }
 0x217   :  { %v1399_v59 = vmax.f32 %v1335_v4, 0.0 }
 0x218   :  { %v1438_v53 = vmax.f32 %v1394_v40, %v1398_v23  ;;  %v3185_v40 = vld [vmem:[#allocation8 + $0xb0] ss:$8 sps:$4 sm:$0xff]   ;;  %v3190_v23 = vld [vmem:[#allocation8 + $0xc4] ss:$8 sps:$4 sm:$0xff]  }
 0x219   :  { %v1439_v54 = vmax.f32 %v1395_v24, %v1399_v59  ;;  %2107 = vmatpush1.bf16.msra.mxu0 %v3170_v51  ;;  %v1183_v55 = vpop.f32.mrb[56].mxu1  ;;  %v3188_v59 = vld [vmem:[#allocation8 + $0xc0] ss:$8 sps:$4 sm:$0xff]  }
 0x21a   :  { %v1458_v8 = vmax.f32 %v3742_v15, %v1438_v53  ;;  %v1338_v26 = vadd.f32 %v3765_v38, %v1183_v55  ;;  %v1185_v28 = vpop.f32.mrb[57].mxu1  ;;  %2108 = vmatprep.subr.bf16.mxu0 %v3175_v52  ;;  %v2746_v55 = vcombine.high %v3351_v0, %v3780_v58 }
 0x21b   :  { %v1459_v62 = vmax.f32 %v3744_v29, %v1439_v54  ;;  %v1339_v9 = vadd.f32 %v3768_v30, %v1185_v28  ;;  %v1187_v14 = vpop.f32.mrb[58].mxu1  ;;  %v3193_v54 = vld [vmem:[#allocation8 + $0xd4] ss:$8 sps:$4 sm:$0xff]   ;;  %v3202_v28 = vld [vmem:[#allocation8 + $0x204] ss:$8 sps:$4 sm:$0xff]  }
 0x21c   :  { %v1342_v10 = vadd.f32 %v3765_v38, %v1187_v14  ;;  %v1189_v12 = vpop.f32.mrb[59].mxu1  ;;  %v2837_v63 = vpack.c.bf16 %v1458_v8, %v1456_v2  ;;  %v1402_v15 = vmax.f32 %v1338_v26, 0.0  ;;  %v3197_v26 = vld [vmem:[#allocation8 + $0xf0] ss:$8 sps:$4 sm:$0xff]  }
 0x21d   :  { %v1343_v21 = vadd.f32 %v3768_v30, %v1189_v12  ;;  %2109 = vmatpush1.bf16.msra.mxu0 %v3173_v56  ;;  %v2838_v11 = vpack.c.bf16 %v1459_v62, %v1457_v20  ;;  %v1403_v34 = vmax.f32 %v1339_v9, 0.0  ;;  %v3182_v20 = vld [vmem:[#allocation8 + $0xa0] ss:$8 sps:$4 sm:$0xff]   ;;  %v3196_v56 = vld [vmem:[#allocation8 + $0xe4] ss:$8 sps:$4 sm:$0xff]  }
 0x21e   :  { %v1406_v13 = vmax.f32 %v1342_v10, 0.0  ;;  %2110 = vmatprep.subr.bf16.mxu0 %v3178_v60  ;;  %v3200_v60 = vld [vmem:[#allocation8 + $0x200] ss:$8 sps:$4 sm:$0xff]   ;;  %v3205_v9 = vld [vmem:[#allocation8 + $0x214] ss:$8 sps:$4 sm:$0xff]  }
 0x21f   :  { %v1407_v17 = vmax.f32 %v1343_v21, 0.0  ;;  %1873 = vmatprep.mubr.bf16.mxu0 %v2838_v11  ;;  %v3203_v14 = vld [vmem:[#allocation8 + $0x210] ss:$8 sps:$4 sm:$0xff]   ;;  %v3208_v10 = vld [vmem:[#allocation8 + $0x224] ss:$8 sps:$4 sm:$0xff]  }
 0x220   :  { %v1442_v29 = vmax.f32 %v1402_v15, %v1406_v13  ;;  %1874 = vmatmul.mubr.bf16.gmra.mrb[40].mxu0 %v2837_v63  ;;  %v3206_v12 = vld [vmem:[#allocation8 + $0x220] ss:$8 sps:$4 sm:$0xff]   ;;  %v3211_v63 = vld [vmem:[#allocation8 + $0x234] ss:$8 sps:$4 sm:$0xff]   ;;  %v3209_v21 = vld [vmem:[#allocation8 + $0x230] ss:$8 sps:$4 sm:$0xff]  }
 0x221   :  { %v1443_v19 = vmax.f32 %v1403_v34, %v1407_v17  ;;  %2111 = vmatpush1.bf16.msra.mxu0 %v3176_v33  ;;  %v1193_v31 = vpop.f32.mrb[60].mxu1  ;;  %v3212_v11 = vld [vmem:[#allocation8 + $0x240] ss:$8 sps:$4 sm:$0xff]   ;;  %v3217_v33 = vld [vmem:[#allocation8 + $0x254] ss:$8 sps:$4 sm:$0xff]  }
 0x222   :  { %v1460_v25 = vmax.f32 %v3750_v6, %v1442_v29  ;;  %v1346_v27 = vadd.f32 %v3765_v38, %v1193_v31  ;;  %v1195_v44 = vpop.f32.mrb[61].mxu1  ;;  %2112 = vmatprep.subr.bf16.mxu0 %v3181_v1  ;;  %v3215_v15 = vld [vmem:[#allocation8 + $0x250] ss:$8 sps:$4 sm:$0xff]   ;;  %v3220_v13 = vld [vmem:[#allocation8 + $0x264] ss:$8 sps:$4 sm:$0xff]  }
 0x223   :  { %v1461_v48 = vmax.f32 %v3752_v61, %v1443_v19  ;;  %v1347_v16 = vadd.f32 %v3768_v30, %v1195_v44  ;;  %v1197_v49 = vpop.f32.mrb[62].mxu1  ;;  %v3218_v1 = vld [vmem:[#allocation8 + $0x260] ss:$8 sps:$4 sm:$0xff]   ;;  %v3223_v34 = vld [vmem:[#allocation8 + $0x274] ss:$8 sps:$4 sm:$0xff]  }
 0x224   :  { %v1350_v2 = vadd.f32 %v3765_v38, %v1197_v49  ;;  %v1199_v18 = vpop.f32.mrb[63].mxu1  ;;  %v3825_v50 = vpack.c.bf16 %v1460_v25, %v1458_v8  ;;  %v1410_v42 = vmax.f32 %v1346_v27, 0.0  ;;  %v3199_v8 = vld [vmem:[#allocation8 + $0xf4] ss:$8 sps:$4 sm:$0xff]   ;;  %v3221_v17 = vld [vmem:[#allocation8 + $0x270] ss:$8 sps:$4 sm:$0xff]  }
 0x225   :  { %v1351_v35 = vadd.f32 %v3768_v30, %v1199_v18  ;;  %2113 = vmatpush1.bf16.msra.mxu0 %v3179_v47  ;;  %v3828_v6 = vpack.c.bf16 %v1461_v48, %v1459_v62  ;;  %v1411_v45 = vmax.f32 %v1347_v16, 0.0  ;;  %v2745_v62 = vcombine.low %v3351_v0, %v3780_v58  ;;  %v3214_v58 = vld [vmem:[#allocation8 + $0x244] ss:$8 sps:$4 sm:$0xff]   ;;  %v3224_v19 = vld [vmem:[#allocation8 + $0x280] ss:$8 sps:$4 sm:$0xff]  }
 0x226   :  { %v1414_v43 = vmax.f32 %v1350_v2, 0.0  ;;  %2114 = vmatprep.subr.bf16.mxu0 %v3184_v37  ;;  %v3226_v29 = vld [vmem:[#allocation8 + $0x284] ss:$8 sps:$4 sm:$0xff]   ;;  %v3229_v31 = vld [vmem:[#allocation8 + $0x294] ss:$8 sps:$4 sm:$0xff]  }
 0x227   :  { %v1415_v61 = vmax.f32 %v1351_v35, 0.0  ;;  %v3227_v47 = vld [vmem:[#allocation8 + $0x290] ss:$8 sps:$4 sm:$0xff]   ;;  %v3230_v27 = vld [vmem:[#allocation8 + $0x2a0] ss:$8 sps:$4 sm:$0xff]  }
 0x228   :  { %v1446_v4 = vmax.f32 %v1410_v42, %v1414_v43  ;;  %v3235_v44 = vld [vmem:[#allocation8 + $0x2b4] ss:$8 sps:$4 sm:$0xff]   ;;  %v3233_v37 = vld [vmem:[#allocation8 + $0x2b0] ss:$8 sps:$4 sm:$0xff]   ;;  %v3244_v2 = vld [vmem:[#allocation8 + $0x2e4] ss:$8 sps:$4 sm:$0xff]  }
 0x229   :  { %v1447_v51 = vmax.f32 %v1411_v45, %v1415_v61  ;;  %2115 = vmatpush1.bf16.msra.mxu0 %v3182_v20  ;;  %v3241_v16 = vld [vmem:[#allocation8 + $0x2d4] ss:$8 sps:$4 sm:$0xff]   ;;  %v3239_v49 = vld [vmem:[#allocation8 + $0x2d0] ss:$8 sps:$4 sm:$0xff]   ;;  %v3242_v18 = vld [vmem:[#allocation8 + $0x2e0] ss:$8 sps:$4 sm:$0xff]  }
 0x22a   :  { %v1462_v38 = vmax.f32 %v3758_v22, %v1446_v4  ;;  %2116 = vmatprep.subr.bf16.mxu0 %v3187_v3  ;;  %v3191_v22 = vld [vmem:[#allocation8 + $0xd0] ss:$8 sps:$4 sm:$0xff]   ;;  %v3247_v35 = vld [vmem:[#allocation8 + $0x2f4] ss:$8 sps:$4 sm:$0xff]  }
 0x22b   :  { %v1463_v30 = vmax.f32 %v3760_v36, %v1447_v51  ;;  %v3194_v36 = vld [vmem:[#allocation8 + $0xe0] ss:$8 sps:$4 sm:$0xff]   ;;  %v3245_v20 = vld [vmem:[#allocation8 + $0x2f0] ss:$8 sps:$4 sm:$0xff]  }
 0x22c   :  { %v2839_v52 = vpack.c.bf16 %v1462_v38, %v1460_v25  ;;  %v3232_v25 = vld [vmem:[#allocation8 + $0x2a4] ss:$8 sps:$4 sm:$0xff]  }
 0x22d   :  { %2117 = vmatpush1.bf16.msra.mxu0 %v3185_v40  ;;  %v2840_v24 = vpack.c.bf16 %v1463_v30, %v1461_v48  ;;  %v3832_v53 = vpack.c.bf16 %v1463_v30, %v1462_v38  ;;  %v3238_v48 = vld [vmem:[#allocation8 + $0x2c4] ss:$8 sps:$4 sm:$0xff]  }
 0x22e   :  { %2118 = vmatprep.subr.bf16.mxu0 %v3190_v23 }
 0x22f   :  { %1883 = vmatprep.mubr.bf16.mxu0 %v2840_v24  ;;  %v2792_v42 = vcombine.high %v3832_v53, %v3351_v0  ;;  %v2791_v43 = vcombine.low %v3832_v53, %v3351_v0 }
 0x230   :  { %1884 = vmatmul.mubr.bf16.gmra.mrb[44].mxu0 %v2839_v52 }
 0x231   :  { %2119 = vmatpush1.bf16.msra.mxu0 %v3188_v59  ;;  %2126 = vmatprep.mubr.bf16.mxu0 %v2746_v55 }
 0x232   :  { %2120 = vmatprep.subr.bf16.mxu0 %v3193_v54 }
 0x235   :  { %2121 = vmatpush1.bf16.msra.mxu0 %v3191_v22 }
 0x236   :  { %2122 = vmatprep.subr.bf16.mxu0 %v3196_v56 }
 0x239   :  { %2123 = vmatpush1.bf16.msra.mxu0 %v3194_v36 }
 0x23a   :  { %2124 = vmatprep.subr.bf16.mxu0 %v3199_v8 }
 0x23d   :  { %2125 = vmatpush1.bf16.msra.mxu0 %v3197_v26 }
 0x23e   :  { %2409 = vmatprep.subr.bf16.mxu0 %v3202_v28 }
 0x240   :  { %2127 = vmatmul.mubr.bf16.vlgmr.msra.gmra.mrb[32].mxu0 %v2745_v62 }
 0x241   :  { %2136 = vmatprep.mubr.bf16.mxu0 %v3796_v7  ;;  %2410 = vmatpush1.bf16.msra.mxu0 %v3200_v60 }
 0x242   :  { %2411 = vmatprep.subr.bf16.mxu0 %v3205_v9 }
 0x245   :  { %2412 = vmatpush1.bf16.msra.mxu0 %v3203_v14 }
 0x246   :  { %2413 = vmatprep.subr.bf16.mxu0 %v3208_v10 }
 0x248   :  { %2137 = vmatmul.mubr.bf16.gmra.mrb[36].mxu0 %v3793_v5 }
 0x249   :  { %2146 = vmatprep.mubr.bf16.mxu0 %v3812_v57  ;;  %2414 = vmatpush1.bf16.msra.mxu0 %v3206_v12 }
 0x24a   :  { %2415 = vmatprep.subr.bf16.mxu0 %v3211_v63 }
 0x24d   :  { %2416 = vmatpush1.bf16.msra.mxu0 %v3209_v21 }
 0x24e   :  { %2417 = vmatprep.subr.bf16.mxu0 %v3214_v58 }
 0x250   :  { %2147 = vmatmul.mubr.bf16.gmra.mrb[40].mxu0 %v3809_v46 }
 0x251   :  { %2156 = vmatprep.mubr.bf16.mxu0 %v3828_v6  ;;  %2418 = vmatpush1.bf16.msra.mxu0 %v3212_v11 }
 0x252   :  { %2419 = vmatprep.subr.bf16.mxu0 %v3217_v33 }
 0x255   :  { %2420 = vmatpush1.bf16.msra.mxu0 %v3215_v15 }
 0x256   :  { %2421 = vmatprep.subr.bf16.mxu0 %v3220_v13 }
 0x258   :  { %2157 = vmatmul.mubr.bf16.gmra.mrb[44].mxu0 %v3825_v50 }
 0x259   :  { %2422 = vmatpush1.bf16.msra.mxu0 %v3218_v1  ;;  %2441 = vmatprep.mubr.bf16.mxu0 %v3796_v7  ;;  %v3236_v7 = vld [vmem:[#allocation8 + $0x2c0] ss:$8 sps:$4 sm:$0xff]  }
 0x25a   :  { %2423 = vmatprep.subr.bf16.mxu0 %v3223_v34 }
 0x25d   :  { %2424 = vmatpush1.bf16.msra.mxu0 %v3221_v17 }
 0x25e   :  { %2425 = vmatprep.subr.bf16.mxu0 %v3226_v29 }
 0x261   :  { %2426 = vmatpush1.bf16.msra.mxu0 %v3224_v19 }
 0x262   :  { %2427 = vmatprep.subr.bf16.mxu0 %v3229_v31 }
 0x265   :  { %2428 = vmatpush1.bf16.msra.mxu0 %v3227_v47 }
 0x266   :  { %2429 = vmatprep.subr.bf16.mxu0 %v3232_v25 }
 0x269   :  { %2430 = vmatpush1.bf16.msra.mxu0 %v3230_v27 }
 0x26a   :  { %2431 = vmatprep.subr.bf16.mxu0 %v3235_v44 }
 0x26d   :  { %2432 = vmatpush1.bf16.msra.mxu0 %v3233_v37 }
 0x26e   :  { %2433 = vmatprep.subr.bf16.mxu0 %v3238_v48 }
 0x271   :  { %2434 = vmatpush1.bf16.msra.mxu0 %v3236_v7 }
 0x272   :  { %2435 = vmatprep.subr.bf16.mxu0 %v3241_v16 }
 0x275   :  { %2436 = vmatpush1.bf16.msra.mxu0 %v3239_v49 }
 0x276   :  { %2437 = vmatprep.subr.bf16.mxu0 %v3244_v2 }
 0x279   :  { %2438 = vmatpush1.bf16.msra.mxu0 %v3242_v18 }
 0x27a   :  { %2439 = vmatprep.subr.bf16.mxu0 %v3247_v35 }
 0x27d   :  { %2440 = vmatpush1.bf16.msra.mxu0 %v3245_v20 }
 0x280   :  { %2442 = vmatmul.mubr.bf16.vlgmr.msra.gmra.mrb[32].mxu0 %v3793_v5  ;;  %v2498_v5 = vld [vmem:[%s3878_s4] sm:$0x3]  ;;  %s3352_s4 = smov 32  }
 0x281   :  { %2451 = vmatprep.mubr.bf16.mxu0 %v3812_v57  ;;  %v2503_v57 = vrot.slane %v2498_v5, %v1270_v39 }
 0x288   :  { %2452 = vmatmul.mubr.bf16.gmra.mrb[36].mxu0 %v3809_v46  ;;  %v2507_v46 = vrot.slane %v2498_v5, %v1274_v41 }
 0x289   :  { %2461 = vmatprep.mubr.bf16.mxu0 %v3828_v6 }
 0x290   :  { %2462 = vmatmul.mubr.bf16.gmra.mrb[40].mxu0 %v3825_v50 }
 0x291   :  { %2471 = vmatprep.mubr.bf16.mxu0 %v2792_v42 }
 0x298   :  { %2472 = vmatmul.mubr.bf16.gmra.mrb[44].mxu0 %v2791_v43 }
 0x353   :  { %v2443_v6 = vpop.f32.mrb[32].mxu0 }
 0x354   :  { %v2510_v3 = vadd.f32 %v2503_v57, %v2443_v6  ;;  %v2445_v45 = vpop.f32.mrb[33].mxu0 }
 0x355   :  { %v2511_v61 = vadd.f32 %v2507_v46, %v2445_v45  ;;  %v2447_v50 = vpop.f32.mrb[34].mxu0 }
 0x356   :  { %v2512_v4 = vadd.f32 %v2503_v57, %v2447_v50  ;;  %v2449_v51 = vpop.f32.mrb[35].mxu0  ;;  %v2526_v0 = vmax.f32 %v2510_v3, 0.0 }
 0x357   :  { %v2513_v40 = vadd.f32 %v2507_v46, %v2449_v51  ;;  %v2527_v23 = vmax.f32 %v2511_v61, 0.0 }
 0x358   :  { %v2528_v38 = vmax.f32 %v2512_v4, 0.0 }
 0x359   :  { %v2529_v30 = vmax.f32 %v2513_v40, 0.0 }
 0x35a   :  { %v2542_v52 = vmax.f32 %v2526_v0, %v2528_v38 }
 0x35b   :  { %v2543_v24 = vmax.f32 %v2527_v23, %v2529_v30  ;;  %v2453_v59 = vpop.f32.mrb[36].mxu0 }
 0x35c   :  { %v2514_v53 = vadd.f32 %v2503_v57, %v2453_v59  ;;  %v2455_v39 = vpop.f32.mrb[37].mxu0 }
 0x35d   :  { %v2550_v54 = vmax.f32 %v2542_v52, %v2543_v24  ;;  %v2515_v32 = vadd.f32 %v2507_v46, %v2455_v39  ;;  %v2457_v41 = vpop.f32.mrb[38].mxu0 }
 0x35e   :  { %v2516_v55 = vadd.f32 %v2503_v57, %v2457_v41  ;;  %v2459_v22 = vpop.f32.mrb[39].mxu0  ;;  %v2530_v36 = vmax.f32 %v2514_v53, 0.0 }
 0x35f   :  { %v2517_v56 = vadd.f32 %v2507_v46, %v2459_v22  ;;  %v2531_v26 = vmax.f32 %v2515_v32, 0.0 }
 0x360   :  { %v2532_v8 = vmax.f32 %v2516_v55, 0.0 }
 0x361   :  { %v2533_v28 = vmax.f32 %v2517_v56, 0.0 }
 0x362   :  { %v2544_v60 = vmax.f32 %v2530_v36, %v2532_v8 }
 0x363   :  { %v2545_v62 = vmax.f32 %v2531_v26, %v2533_v28  ;;  %v2463_v9 = vpop.f32.mrb[40].mxu0 }
 0x364   :  { %v2518_v14 = vadd.f32 %v2503_v57, %v2463_v9  ;;  %v2465_v10 = vpop.f32.mrb[41].mxu0 }
 0x365   :  { %v2551_v12 = vmax.f32 %v2544_v60, %v2545_v62  ;;  %v2519_v63 = vadd.f32 %v2507_v46, %v2465_v10  ;;  %v2467_v21 = vpop.f32.mrb[42].mxu0 }
 0x366   :  { %v2520_v58 = vadd.f32 %v2503_v57, %v2467_v21  ;;  %v2469_v11 = vpop.f32.mrb[43].mxu0  ;;  %v2534_v13 = vmax.f32 %v2518_v14, 0.0 }
 0x367   :  { %v2554_v33 = vadd.f32 %v2551_v12, %v2550_v54  ;;  %v2521_v15 = vadd.f32 %v2507_v46, %v2469_v11  ;;  %v2535_v34 = vmax.f32 %v2519_v63, 0.0 }
 0x368   :  { %v2536_v1 = vmax.f32 %v2520_v58, 0.0 }
 0x369   :  { %v2537_v17 = vmax.f32 %v2521_v15, 0.0 }
 0x36a   :  { %v2546_v29 = vmax.f32 %v2534_v13, %v2536_v1 }
 0x36b   :  { %v2547_v19 = vmax.f32 %v2535_v34, %v2537_v17  ;;  %v2473_v31 = vpop.f32.mrb[44].mxu0 }
 0x36c   :  { %v2522_v47 = vadd.f32 %v2503_v57, %v2473_v31  ;;  %v2475_v25 = vpop.f32.mrb[45].mxu0 }
 0x36d   :  { %v2552_v27 = vmax.f32 %v2546_v29, %v2547_v19  ;;  %v2523_v44 = vadd.f32 %v2507_v46, %v2475_v25  ;;  %v2477_v37 = vpop.f32.mrb[46].mxu0 }
 0x36e   :  { %v2524_v48 = vadd.f32 %v2503_v57, %v2477_v37  ;;  %v2479_v7 = vpop.f32.mrb[47].mxu0  ;;  %v2538_v2 = vmax.f32 %v2522_v47, 0.0 }
 0x36f   :  { %v2555_v16 = vadd.f32 %v2554_v33, %v2552_v27  ;;  %v2525_v49 = vadd.f32 %v2507_v46, %v2479_v7  ;;  %v2539_v35 = vmax.f32 %v2523_v44, 0.0 }
 0x370   :  { %v2540_v18 = vmax.f32 %v2524_v48, 0.0 }
 0x371   :  { %v2541_v20 = vmax.f32 %v2525_v49, 0.0 }
 0x372   :  { %v2548_v42 = vmax.f32 %v2538_v2, %v2540_v18 }
 0x373   :  { %v2549_v43 = vmax.f32 %v2539_v35, %v2541_v20 }
 0x375   :  { %v2553_v5 = vmax.f32 %v2548_v42, %v2549_v43 }
 0x377   :  { %v2556_v6 = vadd.f32 %v2555_v16, %v2553_v5 }
 0x379   :  { %2566 = vrot.lane.b32.xlu1 %v2556_v6, %s3352_s4  ;;  %2558 = vrot.lane.b32.xlu0 %v2556_v6, %s3353_s10 }
 0x37d   :  { %2562 = vrot.lane.b32.xlu0 %v2556_v6, %s3346_s1 }
 0x3eb   :  { %v2559_v3 = vpop.permute.xlu0 %2558  ;;  %v2567_v50 = vpop.permute.xlu1 %2566 }
 0x3ec   :  { %v2561_v45 = vadd.f32 %v2559_v3, %v2556_v6 }
 0x3ef   :  { %v2563_v57 = vpop.permute.xlu0 %2562 }
 0x3f0   :  { %v2565_v61 = vadd.f32 %v2563_v57, %v2561_v45 }
 0x3f2   :  { %v2569_v46 = vadd.f32 %v2567_v50, %v2565_v61 }
 0x3f4   :  { %v2570_v4 = vmul.f32 0.0625, %v2569_v46 }
 0x3f6   :  { %2572 = vst.msk [vmem:[#allocation9] sm:$0xff] %vm2571_vm1, %v2570_v4 }
 0x3f7   :  { %3325 = shalt.err (!%p3322_p0)
}
 0x3f8   :  { %s3326_s16 = scalar_lea.hbm %s3879_s5, 128 }
 0x3f9   :  { %p3327_p1 = scmp.ne.s32.totalorder %s3879_s5, %s3326_s16  ;;  %p3330_p2 = scmp.lt.u32.totalorder %s3326_s16, %s3879_s5 }
 0x3fb   :  { %p3332_p3 = pnand %p3330_p2, %p3327_p1 }
 0x3fd   :  { %3335 = shalt.err (!%p3332_p3)
}
 0x3fe   :  { %2582 = dma.vmem_to_hbm [thread:$0]  %s2580_s12, 128, %s3879_s5, [#allocation5]  }
 0x3ff   :  { %3340 = dma.done.wait [#allocation5], 128  }
 0x400   :  { %3341 = vsyncadd [#allocation5], 4294967168 }
 0x401   :  { %2586 = vsyncpa [#allocation4], 1 }
 0x402   :  { %2587 = vsyncpa [#allocation7], 1 }
 0x403   :  { %2588 = vsyncpa [#allocation5], 1 }

</bundles_post_ra>
